<compile_context>
chip_gen: v6e
topology: v6e:2x2x1
jax: 0.10.0
libtpu: 0.0.40
codegen_flags: <defaults>
</compile_context>

<pallas_src>
import jax
import jax.numpy as jnp
from jax.experimental import pallas as pl
from jax.experimental.pallas import tpu as pltpu

NEG_SLOPE = 0.01  # PyTorch F.leaky_relu default


def _tower_kernel(x_ref,
                  w1_ref, s1_ref, w2_ref, s2_ref,
                  w3_ref, s3_ref, w4_ref, s4_ref,
                  o_ref):
    """o = L4(L3(L2(L1(x)))) with Li(h) = leaky_relu(h @ Wi' + shifti'); all on-chip."""

    def layer(h, w_ref, s_ref):
        # bf16 x bf16 on the MXU, fp32 accumulation.
        z = jnp.dot(h.astype(w_ref.dtype), w_ref[...],
                    preferred_element_type=jnp.float32)
        z = z + s_ref[...]                       # folded (bias + BN) affine, fp32
        return jnp.where(z > 0, z, NEG_SLOPE * z)  # LeakyReLU, fp32 (v5e-safe)

    h = x_ref[...].astype(jnp.float32)
    h = layer(h, w1_ref, s1_ref)
    h = layer(h, w2_ref, s2_ref)
    h = layer(h, w3_ref, s3_ref)
    h = layer(h, w4_ref, s4_ref)
    o_ref[...] = h.astype(o_ref.dtype)


def make_params(initial_layers, key):
    """Deterministic params matching TowerModel's shapes, with BN+bias folded into weights."""
    dims = [initial_layers, 1024, 512, 256, 128]
    eps = 1e-5  # nn.BatchNorm1d default
    params = []
    for i in range(4):
        fin, fout = dims[i], dims[i + 1]
        key, kw, kb, kg, kbe, km, kv = jax.random.split(key, 7)
        bound = 1.0 / jnp.sqrt(jnp.float32(fin))
        w = jax.random.uniform(kw, (fout, fin), jnp.float32, -bound, bound)  # torch [out, in]
        b = jax.random.uniform(kb, (fout,), jnp.float32, -bound, bound)
        gamma = 1.0 + 0.1 * jax.random.normal(kg, (fout,), jnp.float32)
        beta = 0.1 * jax.random.normal(kbe, (fout,), jnp.float32)
        running_mean = 0.05 * jax.random.normal(km, (fout,), jnp.float32)
        running_var = 1.0 + 0.1 * jax.random.uniform(kv, (fout,), jnp.float32)

        # Eval-mode BN as per-feature affine, then fold bias+BN into the weights.
        scale = gamma / jnp.sqrt(running_var + eps)          # [fout]
        shift = beta - running_mean * scale                  # [fout]
        w_fold = jnp.transpose(w) * scale[None, :]           # [fin, fout]
        s_fold = b * scale + shift                           # [fout]

        params.append(dict(
            w=w_fold.astype(jnp.bfloat16),                   # bf16 weights: half the HBM bytes
            s=s_fold.reshape(1, fout).astype(jnp.float32),   # keep affine fp32
        ))
    return params


@jax.jit
def tower_forward(x, params):
    # TODO(synk): training-mode dropout (Bernoulli masks) not implemented; eval semantics only.
    B, Fin = x.shape
    dims = [Fin] + [int(p["w"].shape[1]) for p in params]
    Fout = dims[-1]

    # Batch tiling: single full-batch block for small B, else 256-row tiles.
    if B <= 256:
        TM, Bp = B, B
    else:
        TM = 256
        Bp = pl.cdiv(B, TM) * TM
    if Bp != B:
        x = jnp.pad(x, ((0, Bp - B), (0, 0)))

    grid = (Bp // TM,)

    x_spec = pl.BlockSpec((TM, Fin), lambda i: (i, 0))
    out_spec = pl.BlockSpec((TM, Fout), lambda i: (i, 0))
    param_specs = []
    for p in params:
        fi, fo = p["w"].shape
        # Whole weight / shift stays VMEM-resident across all grid steps.
        param_specs.append(pl.BlockSpec((fi, fo), lambda i: (0, 0)))
        param_specs.append(pl.BlockSpec((1, fo), lambda i: (0, 0)))

    flops = 2 * Bp * sum(dims[i] * dims[i + 1] for i in range(4))
    bytes_accessed = (
        Bp * Fin * 4 + Bp * Fout * 4
        + sum(p["w"].size * p["w"].dtype.itemsize
              + p["s"].size * p["s"].dtype.itemsize for p in params)
    )

    args = [x]
    for p in params:
        args.append(p["w"])
        args.append(p["s"])

    out = pl.pallas_call(
        _tower_kernel,
        out_shape=jax.ShapeDtypeStruct((Bp, Fout), jnp.float32),
        grid=grid,
        in_specs=[x_spec] + param_specs,
        out_specs=out_spec,
        compiler_params=pltpu.CompilerParams(
            dimension_semantics=("parallel",)),   # shards batch tiles across v7x's 2 TCs
        cost_estimate=pl.CostEstimate(
            flops=flops, transcendentals=0, bytes_accessed=bytes_accessed),
    )(*args)
    return out[:B]


def tower_forward_ref(x, params):
    """Pure-JAX reference with identical math (bf16 operands, fp32 accumulation)."""
    h = x
    for p in params:
        z = jax.lax.dot(h.astype(jnp.bfloat16), p["w"],
                        preferred_element_type=jnp.float32)
        z = z + p["s"]
        h = jnp.where(z > 0, z, NEG_SLOPE * z)
    return h


if __name__ == "__main__":
    key = jax.random.PRNGKey(0)
    k_in, k_par = jax.random.split(key)

    batch = 8
    initial_layers = 32
    x = jax.random.normal(k_in, (batch, initial_layers), jnp.float32)
    params = make_params(initial_layers, k_par)

    out = jax.block_until_ready(tower_forward(x, params))
    ref = tower_forward_ref(x, params)

    assert out.shape == (batch, 128), out.shape
    assert jnp.allclose(out, ref, atol=1e-2, rtol=1e-2), "mismatch vs reference"

    print("KERNEL_OK")
</pallas_src>

<mosaic_0001>
module attributes {stable_mosaic.version = 11 : i64} {
  func.func @_tower_kernel(%arg0: i32, %arg1: memref<8x32xf32, #tpu.memory_space<vmem>>, %arg2: memref<32x1024xbf16, #tpu.memory_space<vmem>>, %arg3: memref<1x1024xf32, #tpu.memory_space<vmem>>, %arg4: memref<1024x512xbf16, #tpu.memory_space<vmem>>, %arg5: memref<1x512xf32, #tpu.memory_space<vmem>>, %arg6: memref<512x256xbf16, #tpu.memory_space<vmem>>, %arg7: memref<1x256xf32, #tpu.memory_space<vmem>>, %arg8: memref<256x128xbf16, #tpu.memory_space<vmem>>, %arg9: memref<1x128xf32, #tpu.memory_space<vmem>>, %arg10: memref<8x128xf32, #tpu.memory_space<vmem>>) attributes {dimension_semantics = [#tpu.dimension_semantics<parallel>], iteration_bounds = array<i64: 1>, scalar_prefetch = 0 : i64, scratch_operands = 0 : i64, tpu.core_type = #tpu.core_type<tc>, window_params = [{transform_indices = @transform_0, window_bounds = array<i64: 8, 32>}, {pipeline_mode = #tpu.pipeline_mode<synchronous>, transform_indices = @transform_1, window_bounds = array<i64: 32, 1024>}, {pipeline_mode = #tpu.pipeline_mode<synchronous>, transform_indices = @transform_2, window_bounds = array<i64: 1, 1024>}, {pipeline_mode = #tpu.pipeline_mode<synchronous>, transform_indices = @transform_3, window_bounds = array<i64: 1024, 512>}, {pipeline_mode = #tpu.pipeline_mode<synchronous>, transform_indices = @transform_4, window_bounds = array<i64: 1, 512>}, {pipeline_mode = #tpu.pipeline_mode<synchronous>, transform_indices = @transform_5, window_bounds = array<i64: 512, 256>}, {pipeline_mode = #tpu.pipeline_mode<synchronous>, transform_indices = @transform_6, window_bounds = array<i64: 1, 256>}, {pipeline_mode = #tpu.pipeline_mode<synchronous>, transform_indices = @transform_7, window_bounds = array<i64: 256, 128>}, {pipeline_mode = #tpu.pipeline_mode<synchronous>, transform_indices = @transform_8, window_bounds = array<i64: 1, 128>}, {transform_indices = @transform_9, window_bounds = array<i64: 8, 128>}]} {
    %c0 = arith.constant 0 : index
    %c0_0 = arith.constant 0 : index
    %0 = vector.load %arg1[%c0, %c0_0] : memref<8x32xf32, #tpu.memory_space<vmem>>, vector<8x32xf32>
    %1 = arith.truncf %0 : vector<8x32xf32> to vector<8x32xbf16>
    %c0_1 = arith.constant 0 : index
    %c0_2 = arith.constant 0 : index
    %2 = vector.load %arg2[%c0_1, %c0_2] : memref<32x1024xbf16, #tpu.memory_space<vmem>>, vector<32x1024xbf16>
    %cst = arith.constant dense<0.000000e+00> : vector<8x1024xf32>
    %3 = tpu.matmul %1, %2, %cst {dimension_numbers = #tpu.dot_dimension_numbers<[1], [0], [0], [1], [0, 0, 1, 1], [], []>} : vector<8x32xbf16>, vector<32x1024xbf16>, vector<8x1024xf32> -> vector<8x1024xf32>
    %c0_3 = arith.constant 0 : index
    %c0_4 = arith.constant 0 : index
    %4 = vector.load %arg3[%c0_3, %c0_4] : memref<1x1024xf32, #tpu.memory_space<vmem>>, vector<1x1024xf32>
    %5 = vector.broadcast %4 : vector<1x1024xf32> to vector<8x1024xf32>
    %6 = arith.addf %3, %5 : vector<8x1024xf32>
    %cst_5 = arith.constant 0.000000e+00 : f32
    %7 = vector.broadcast %cst_5 : f32 to vector<8x1024xf32>
    %8 = arith.cmpf ogt, %6, %7 : vector<8x1024xf32>
    %cst_6 = arith.constant 0.00999999977 : f32
    %9 = vector.broadcast %cst_6 : f32 to vector<8x1024xf32>
    %10 = arith.mulf %9, %6 : vector<8x1024xf32>
    %11 = arith.select %8, %6, %10 : vector<8x1024xi1>, vector<8x1024xf32>
    %12 = arith.truncf %11 : vector<8x1024xf32> to vector<8x1024xbf16>
    %c0_7 = arith.constant 0 : index
    %c0_8 = arith.constant 0 : index
    %13 = vector.load %arg4[%c0_7, %c0_8] : memref<1024x512xbf16, #tpu.memory_space<vmem>>, vector<1024x512xbf16>
    %cst_9 = arith.constant dense<0.000000e+00> : vector<8x512xf32>
    %14 = tpu.matmul %12, %13, %cst_9 {dimension_numbers = #tpu.dot_dimension_numbers<[1], [0], [0], [1], [0, 0, 1, 1], [], []>} : vector<8x1024xbf16>, vector<1024x512xbf16>, vector<8x512xf32> -> vector<8x512xf32>
    %c0_10 = arith.constant 0 : index
    %c0_11 = arith.constant 0 : index
    %15 = vector.load %arg5[%c0_10, %c0_11] : memref<1x512xf32, #tpu.memory_space<vmem>>, vector<1x512xf32>
    %16 = vector.broadcast %15 : vector<1x512xf32> to vector<8x512xf32>
    %17 = arith.addf %14, %16 : vector<8x512xf32>
    %cst_12 = arith.constant 0.000000e+00 : f32
    %18 = vector.broadcast %cst_12 : f32 to vector<8x512xf32>
    %19 = arith.cmpf ogt, %17, %18 : vector<8x512xf32>
    %cst_13 = arith.constant 0.00999999977 : f32
    %20 = vector.broadcast %cst_13 : f32 to vector<8x512xf32>
    %21 = arith.mulf %20, %17 : vector<8x512xf32>
    %22 = arith.select %19, %17, %21 : vector<8x512xi1>, vector<8x512xf32>
    %23 = arith.truncf %22 : vector<8x512xf32> to vector<8x512xbf16>
    %c0_14 = arith.constant 0 : index
    %c0_15 = arith.constant 0 : index
    %24 = vector.load %arg6[%c0_14, %c0_15] : memref<512x256xbf16, #tpu.memory_space<vmem>>, vector<512x256xbf16>
    %cst_16 = arith.constant dense<0.000000e+00> : vector<8x256xf32>
    %25 = tpu.matmul %23, %24, %cst_16 {dimension_numbers = #tpu.dot_dimension_numbers<[1], [0], [0], [1], [0, 0, 1, 1], [], []>} : vector<8x512xbf16>, vector<512x256xbf16>, vector<8x256xf32> -> vector<8x256xf32>
    %c0_17 = arith.constant 0 : index
    %c0_18 = arith.constant 0 : index
    %26 = vector.load %arg7[%c0_17, %c0_18] : memref<1x256xf32, #tpu.memory_space<vmem>>, vector<1x256xf32>
    %27 = vector.broadcast %26 : vector<1x256xf32> to vector<8x256xf32>
    %28 = arith.addf %25, %27 : vector<8x256xf32>
    %cst_19 = arith.constant 0.000000e+00 : f32
    %29 = vector.broadcast %cst_19 : f32 to vector<8x256xf32>
    %30 = arith.cmpf ogt, %28, %29 : vector<8x256xf32>
    %cst_20 = arith.constant 0.00999999977 : f32
    %31 = vector.broadcast %cst_20 : f32 to vector<8x256xf32>
    %32 = arith.mulf %31, %28 : vector<8x256xf32>
    %33 = arith.select %30, %28, %32 : vector<8x256xi1>, vector<8x256xf32>
    %34 = arith.truncf %33 : vector<8x256xf32> to vector<8x256xbf16>
    %c0_21 = arith.constant 0 : index
    %c0_22 = arith.constant 0 : index
    %35 = vector.load %arg8[%c0_21, %c0_22] : memref<256x128xbf16, #tpu.memory_space<vmem>>, vector<256x128xbf16>
    %cst_23 = arith.constant dense<0.000000e+00> : vector<8x128xf32>
    %36 = tpu.matmul %34, %35, %cst_23 {dimension_numbers = #tpu.dot_dimension_numbers<[1], [0], [0], [1], [0, 0, 1, 1], [], []>} : vector<8x256xbf16>, vector<256x128xbf16>, vector<8x128xf32> -> vector<8x128xf32>
    %c0_24 = arith.constant 0 : index
    %c0_25 = arith.constant 0 : index
    %37 = vector.load %arg9[%c0_24, %c0_25] : memref<1x128xf32, #tpu.memory_space<vmem>>, vector<1x128xf32>
    %38 = vector.broadcast %37 : vector<1x128xf32> to vector<8x128xf32>
    %39 = arith.addf %36, %38 : vector<8x128xf32>
    %cst_26 = arith.constant 0.000000e+00 : f32
    %40 = vector.broadcast %cst_26 : f32 to vector<8x128xf32>
    %41 = arith.cmpf ogt, %39, %40 : vector<8x128xf32>
    %cst_27 = arith.constant 0.00999999977 : f32
    %42 = vector.broadcast %cst_27 : f32 to vector<8x128xf32>
    %43 = arith.mulf %42, %39 : vector<8x128xf32>
    %44 = arith.select %41, %39, %43 : vector<8x128xi1>, vector<8x128xf32>
    %c0_28 = arith.constant 0 : index
    %c0_29 = arith.constant 0 : index
    %45 = vector.load %arg10[%c0_28, %c0_29] : memref<8x128xf32, #tpu.memory_space<vmem>>, vector<8x128xf32>
    tpu.vector_store %arg10[%c0_28, %c0_29], %44 {strides = array<i32>} : memref<8x128xf32, #tpu.memory_space<vmem>>, vector<8x128xf32>,
    return
  }
  func.func @transform_0(%arg0: i32) -> (i32, i32) {
    %c0_i32 = arith.constant 0 : i32
    %c0_i32_0 = arith.constant 0 : i32
    return %arg0, %c0_i32 : i32, i32
  }
  func.func @transform_1(%arg0: i32) -> (i32, i32) {
    %c0_i32 = arith.constant 0 : i32
    %c0_i32_0 = arith.constant 0 : i32
    %c0_i32_1 = arith.constant 0 : i32
    return %c0_i32, %c0_i32_0 : i32, i32
  }
  func.func @transform_2(%arg0: i32) -> (i32, i32) {
    %c0_i32 = arith.constant 0 : i32
    %c0_i32_0 = arith.constant 0 : i32
    %c0_i32_1 = arith.constant 0 : i32
    return %c0_i32, %c0_i32_0 : i32, i32
  }
  func.func @transform_3(%arg0: i32) -> (i32, i32) {
    %c0_i32 = arith.constant 0 : i32
    %c0_i32_0 = arith.constant 0 : i32
    %c0_i32_1 = arith.constant 0 : i32
    return %c0_i32, %c0_i32_0 : i32, i32
  }
  func.func @transform_4(%arg0: i32) -> (i32, i32) {
    %c0_i32 = arith.constant 0 : i32
    %c0_i32_0 = arith.constant 0 : i32
    %c0_i32_1 = arith.constant 0 : i32
    return %c0_i32, %c0_i32_0 : i32, i32
  }
  func.func @transform_5(%arg0: i32) -> (i32, i32) {
    %c0_i32 = arith.constant 0 : i32
    %c0_i32_0 = arith.constant 0 : i32
    %c0_i32_1 = arith.constant 0 : i32
    return %c0_i32, %c0_i32_0 : i32, i32
  }
  func.func @transform_6(%arg0: i32) -> (i32, i32) {
    %c0_i32 = arith.constant 0 : i32
    %c0_i32_0 = arith.constant 0 : i32
    %c0_i32_1 = arith.constant 0 : i32
    return %c0_i32, %c0_i32_0 : i32, i32
  }
  func.func @transform_7(%arg0: i32) -> (i32, i32) {
    %c0_i32 = arith.constant 0 : i32
    %c0_i32_0 = arith.constant 0 : i32
    %c0_i32_1 = arith.constant 0 : i32
    return %c0_i32, %c0_i32_0 : i32, i32
  }
  func.func @transform_8(%arg0: i32) -> (i32, i32) {
    %c0_i32 = arith.constant 0 : i32
    %c0_i32_0 = arith.constant 0 : i32
    %c0_i32_1 = arith.constant 0 : i32
    return %c0_i32, %c0_i32_0 : i32, i32
  }
  func.func @transform_9(%arg0: i32) -> (i32, i32) {
    %c0_i32 = arith.constant 0 : i32
    %c0_i32_0 = arith.constant 0 : i32
    return %arg0, %c0_i32 : i32, i32
  }
}

</mosaic_0001>

<bundles_post_ra>
// kernel: tower_forward.1
= control target key start
LH: loop header
LB: loop body
LE: loop exit
PB: predicated region body
PF: predicated region fallthrough
CT: control target
= control target key end

     0   :  { %14 = vsyncpa [#allocation3], 0  ;;  %s4282_s0 = inlined_call_operand.hbm [shape: f32[8,32], index: 0, kind: input, shape index: {}]   ;;  %s4283_s1 = inlined_call_operand.hbm [shape: bf16[32,1024], index: 1, kind: input, shape index: {}]   ;;  %s4284_s2 = inlined_call_operand.hbm [shape: f32[1,1024], index: 2, kind: input, shape index: {}]   ;;  %s4285_s3 = inlined_call_operand.hbm [shape: bf16[1024,512], index: 3, kind: input, shape index: {}]   ;;  %s4286_s4 = inlined_call_operand.vmem [shape: f32[1,512], index: 4, kind: input, shape index: {}]   ;;  %s4287_s5 = inlined_call_operand.hbm [shape: bf16[512,256], index: 5, kind: input, shape index: {}]   ;;  %s4288_s6 = inlined_call_operand.vmem [shape: f32[1,256], index: 6, kind: input, shape index: {}]   ;;  %s4289_s7 = inlined_call_operand.hbm [shape: bf16[256,128], index: 7, kind: input, shape index: {}]   ;;  %s4290_s8 = inlined_call_operand.vmem [shape: f32[1,128], index: 8, kind: input, shape index: {}]   ;;  %s4291_s9 = inlined_call_operand.hbm [shape: f32[8,128], index: 9, kind: output, shape index: {}]  }
   0x1   :  { %15 = vsyncpa [#allocation6], 0 }
   0x2   :  { %16 = vsyncpa [#allocation9], 0 }
   0x3   :  { %17 = vsyncpa [#allocation12], 0 }
   0x4   :  { %18 = vsyncpa [#allocation4], 0  ;;  %s4078_s30 = smov [#allocation5]  }
   0x5   :  { %s34_s10 = sshll.u32 %s4078_s30, 4  ;;  %s35_s10 = int_to_ptr.vmem [resolvable:$true] %s34_s10 }
   0x6   :  { %s3936_s11 = scalar_lea.vmem %s35_s10, 2048  ;;  %p3941_p1 = scmp.lt.s32.totalorder %s35_s10, %s35_s10 }
   0x7   :  { %p3937_p0 = scmp.ne.s32.totalorder %s35_s10, %s3936_s11  ;;  %p3942_p2 = scmp.lt.s32.totalorder %s3936_s11, %s3936_s11 }
   0x9   :  { %p3943_p3 = por %p3942_p2, %p3941_p1 }
   0xb   :  { %p3944_p4 = pnand %p3943_p3, %p3937_p0 }
   0xd   :  { %3947 = shalt.err (!%p3944_p4)
}
   0xe   :  { %s4079_s12 = smov 512   ;;  %s4080_s13 = smov 32  }
   0xf   :  { %40 = dma.hbm_to_vmem [thread:$0]  %s4283_s1, 2048, %s35_s10, [#allocation6], %s4079_s12, %s4079_s12, %s4080_s13  }
  0x10   :  { %s4081_s16 = smov [#allocation8]  }
  0x11   :  { %s56_s17 = sshll.u32 %s4081_s16, 4  ;;  %s57_s17 = int_to_ptr.vmem [resolvable:$true] %s56_s17 }
  0x12   :  { %s3956_s18 = scalar_lea.vmem %s57_s17, 32768  ;;  %p3961_p6 = scmp.lt.s32.totalorder %s57_s17, %s57_s17 }
  0x13   :  { %p3957_p5 = scmp.ne.s32.totalorder %s57_s17, %s3956_s18  ;;  %p3962_p7 = scmp.lt.s32.totalorder %s3956_s18, %s3956_s18 }
  0x15   :  { %p3963_p8 = por %p3962_p7, %p3961_p6 }
  0x17   :  { %p3964_p9 = pnand %p3963_p8, %p3957_p5 }
  0x19   :  { %3967 = shalt.err (!%p3964_p9)
}
  0x1a   :  { %s4082_s19 = smov 256   ;;  %s4083_s20 = smov 16  }
  0x1b   :  { %62 = dma.hbm_to_vmem [thread:$0]  %s4285_s3, 32768, %s57_s17, [#allocation9], %s4082_s19, %s4082_s19, %s4083_s20  }
  0x1c   :  { %s4084_s23 = smov [#allocation2]   ;;  %s4085_s25 = smov [#allocation7]  }
  0x1d   :  { %s25_s24 = sshll.u32 %s4084_s23, 4  ;;  %s47_s1 = sshll.u32 %s4085_s25, 4  ;;  %s26_s24 = int_to_ptr.vmem [resolvable:$true] %s25_s24  ;;  %s48_s1 = int_to_ptr.vmem [resolvable:$true] %s47_s1 }
  0x1e   :  { %s3976_s26 = scalar_lea.vmem %s26_s24, 128  ;;  %p3981_p11 = scmp.lt.s32.totalorder %s26_s24, %s26_s24 }
  0x1f   :  { %p3977_p10 = scmp.ne.s32.totalorder %s26_s24, %s3976_s26  ;;  %p3982_p12 = scmp.lt.s32.totalorder %s3976_s26, %s3976_s26 }
  0x21   :  { %p3983_p13 = por %p3982_p12, %p3981_p11 }
  0x23   :  { %p3984_p0 = pnand %p3983_p13, %p3977_p10 }
  0x25   :  { %3987 = shalt.err (!%p3984_p0)
}
  0x26   :  { %28 = dma.hbm_to_vmem [thread:$0]  %s4282_s0, 128, %s26_s24, [#allocation3]  }
  0x27   :  { %s3996_s29 = scalar_lea.vmem %s48_s1, 128  ;;  %p4001_p2 = scmp.lt.s32.totalorder %s48_s1, %s48_s1 }
  0x28   :  { %p3997_p1 = scmp.ne.s32.totalorder %s48_s1, %s3996_s29  ;;  %p4002_p3 = scmp.lt.s32.totalorder %s3996_s29, %s3996_s29 }
  0x2a   :  { %p4003_p4 = por %p4002_p3, %p4001_p2 }
  0x2c   :  { %p4004_p5 = pnand %p4003_p4, %p3997_p1 }
  0x2e   :  { %4007 = shalt.err (!%p4004_p5)
}
  0x2f   :  { %50 = dma.hbm_to_vmem [thread:$0]  %s4284_s2, 128, %s48_s1, [#allocation6]  }
  0x30   :  { %s4086_s10 = smov [#allocation10]  }
  0x31   :  { %s70_s11 = sshll.u32 %s4086_s10, 4  ;;  %s71_s11 = int_to_ptr.vmem [resolvable:$true] %s70_s11 }
  0x32   :  { %s4016_s12 = scalar_lea.vmem %s71_s11, 8192  ;;  %p4021_p7 = scmp.lt.s32.totalorder %s71_s11, %s71_s11 }
  0x33   :  { %p4017_p6 = scmp.ne.s32.totalorder %s71_s11, %s4016_s12  ;;  %p4022_p8 = scmp.lt.s32.totalorder %s4016_s12, %s4016_s12 }
  0x35   :  { %p4023_p9 = por %p4022_p8, %p4021_p7 }
  0x37   :  { %p4024_p10 = pnand %p4023_p9, %p4017_p6 }
  0x39   :  { %4027 = shalt.err (!%p4024_p10)
}
  0x3a   :  { %s4087_s0 = smov 128   ;;  %s4088_s13 = smov 8  }
  0x3b   :  { %76 = dma.hbm_to_vmem [thread:$0]  %s4287_s5, 8192, %s71_s11, [#allocation9], %s4087_s0, %s4087_s0, %s4088_s13  }
  0x3c   :  { %s4089_s16 = smov [#allocation11]  }
  0x3d   :  { %s84_s17 = sshll.u32 %s4089_s16, 4  ;;  %s85_s17 = int_to_ptr.vmem [resolvable:$true] %s84_s17 }
  0x3e   :  { %s4036_s2 = scalar_lea.vmem %s85_s17, 2048  ;;  %p4041_p12 = scmp.lt.s32.totalorder %s85_s17, %s85_s17 }
  0x3f   :  { %p4037_p11 = scmp.ne.s32.totalorder %s85_s17, %s4036_s2  ;;  %p4042_p13 = scmp.lt.s32.totalorder %s4036_s2, %s4036_s2 }
  0x41   :  { %p4043_p0 = por %p4042_p13, %p4041_p12 }
  0x43   :  { %p4044_p1 = pnand %p4043_p0, %p4037_p11 }
  0x45   :  { %4047 = shalt.err (!%p4044_p1)
}
  0x46   :  { %s4090_s18 = smov 64   ;;  %s4091_s19 = smov 4  }
  0x47   :  { %90 = dma.hbm_to_vmem [thread:$0]  %s4289_s7, 2048, %s85_s17, [#allocation12], %s4090_s18, %s4090_s18, %s4091_s19  }
  0x48   :  { %4068 = dma.done.wait [#allocation3], 128  }
  0x49   :  { %4069 = vsyncadd [#allocation3], 4294967168 }
  0x4a   :  { %4070 = dma.done.wait [#allocation6], 2176  }
  0x4b   :  { %4071 = vsyncadd [#allocation6], 4294965120 }
  0x4c   :  { %4072 = dma.done.wait [#allocation9], 40960  }
  0x4d   :  { %4073 = vsyncadd [#allocation9], 4294926336 }
  0x4e   :  { %4074 = dma.done.wait [#allocation12], 2048  }
  0x4f   :  { %4075 = vsyncadd [#allocation12], 4294965248  ;;  %v4092_v0 = vmov 0   ;;  %v122_v1 = vld [vmem:[#allocation5 + $0x40] sm:$0xff]  ;;  %v123_v8 = vld [vmem:[#allocation5 + $0x48] sm:$0xff]  ;;  %vm252_vm0 = vcmask 261120  }
  0x50   :  { %288 = vmatprep.mubr.bf16.mxu1 %v4092_v0  ;;  %v126_v2 = vld [vmem:[#allocation5 + $0x60] sm:$0xff]  ;;  %v127_v9 = vld [vmem:[#allocation5 + $0x68] sm:$0xff]  ;;  %v112_v11 = vld [vmem:[#allocation2] sm:$0xff]  ;;  %s4093_s24 = smov [#allocation13]  }
  0x51   :  { %v114_v3 = vld [vmem:[#allocation5] sm:$0xff]  ;;  %v3046_v4 = vcombine.high %v122_v1, %v126_v2  ;;  %v3045_v5 = vcombine.low %v122_v1, %v126_v2  ;;  %v3048_v12 = vcombine.high %v123_v8, %v127_v9  ;;  %v115_v13 = vld [vmem:[#allocation5 + $0x8] sm:$0xff]  ;;  %v4163_v17 = vpack.c.bf16 %v112_v11, %v112_v11  ;;  %v124_v22 = vld [vmem:[#allocation5 + $0x50] sm:$0xff]  ;;  %s3025_s25 = sshll.u32 %s4093_s24, 4  ;;  %s3026_s25 = int_to_ptr.vmem [resolvable:$true] %s3025_s25 }
  0x52   :  { %v118_v6 = vld [vmem:[#allocation5 + $0x20] sm:$0xff]  ;;  %v119_v14 = vld [vmem:[#allocation5 + $0x28] sm:$0xff]  ;;  %v3047_v19 = vcombine.low %v123_v8, %v127_v9  ;;  %v128_v23 = vld [vmem:[#allocation5 + $0x70] sm:$0xff]  ;;  %s4048_s1 = scalar_lea.vmem %s3026_s25, 128  ;;  %p4053_p3 = scmp.lt.s32.totalorder %s3026_s25, %s3026_s25 }
  0x53   :  { %v3038_v7 = vcombine.high %v114_v3, %v118_v6  ;;  %268 = vmatprep.subr.bf16.mxu1 %v3046_v4  ;;  %v3037_v10 = vcombine.low %v114_v3, %v118_v6  ;;  %v3432_v15 = vld [vmem:[#allocation8 + $0xe4] ss:$16 sps:$4 sm:$0xff]   ;;  %v3434_v16 = vld [vmem:[#allocation8 + $0xe0] ss:$16 sps:$4 sm:$0xff]   ;;  %v3040_v20 = vcombine.high %v115_v13, %v119_v14  ;;  %v3039_v25 = vcombine.low %v115_v13, %v119_v14  ;;  %v116_v26 = vld [vmem:[#allocation5 + $0x10] sm:$0xff]  ;;  %p4049_p2 = scmp.ne.s32.totalorder %s3026_s25, %s4048_s1  ;;  %p4054_p4 = scmp.lt.s32.totalorder %s4048_s1, %s4048_s1 }
  0x54   :  { %269 = vmatpush1.bf16.msra.mxu1 %v3045_v5  ;;  %v3435_v18 = vld [vmem:[#allocation8 + $0xc4] ss:$16 sps:$4 sm:$0xff]   ;;  %2010 = vmatprep.subr.bf16.mxu0 %v3432_v15  ;;  %v3437_v21 = vld [vmem:[#allocation8 + $0xc0] ss:$16 sps:$4 sm:$0xff]   ;;  %v3050_v27 = vcombine.high %v124_v22, %v128_v23  ;;  %v120_v28 = vld [vmem:[#allocation5 + $0x30] sm:$0xff]  ;;  %v3049_v31 = vcombine.low %v124_v22, %v128_v23 }
  0x55   :  { %270 = vmatprep.subr.bf16.mxu1 %v3038_v7  ;;  %2011 = vmatpush1.bf16.msra.mxu0 %v3434_v16  ;;  %v3438_v24 = vld [vmem:[#allocation8 + $0xa4] ss:$16 sps:$4 sm:$0xff]   ;;  %v3443_v29 = vld [vmem:[#allocation8 + $0xa0] ss:$16 sps:$4 sm:$0xff]   ;;  %v3042_v32 = vcombine.high %v116_v26, %v120_v28  ;;  %v3041_v37 = vcombine.low %v116_v26, %v120_v28  ;;  %p4055_p5 = por %p4054_p4, %p4053_p3 }
  0x56   :  { %2012 = vmatprep.subr.bf16.mxu0 %v3435_v18  ;;  %v3444_v30 = vld [vmem:[#allocation8 + $0x84] ss:$16 sps:$4 sm:$0xff]   ;;  %v3449_v33 = vld [vmem:[#allocation8 + $0x80] ss:$16 sps:$4 sm:$0xff]  }
  0x57   :  { %v125_v34 = vld [vmem:[#allocation5 + $0x58] sm:$0xff]  ;;  %p4056_p6 = pnand %p4055_p5, %p4049_p2 }
  0x58   :  { %271 = vmatpush1.bf16.msra.mxu1 %v3037_v10  ;;  %v129_v35 = vld [vmem:[#allocation5 + $0x78] sm:$0xff] }
  0x59   :  { %309 = vmatprep.subr.bf16.mxu1 %v3048_v12  ;;  %2013 = vmatpush1.bf16.msra.mxu0 %v3437_v21  ;;  %v3450_v36 = vld [vmem:[#allocation8 + $0x64] ss:$16 sps:$4 sm:$0xff]   ;;  %v3052_v39 = vcombine.high %v125_v34, %v129_v35  ;;  %v3455_v41 = vld [vmem:[#allocation8 + $0x60] ss:$16 sps:$4 sm:$0xff]   ;;  %v3051_v43 = vcombine.low %v125_v34, %v129_v35 }
  0x5a   :  { %2014 = vmatprep.subr.bf16.mxu0 %v3438_v24  ;;  %v117_v38 = vld [vmem:[#allocation5 + $0x18] sm:$0xff] }
  0x5b   :  { %3053 = vmatmul.mubr.msk.bf16.vlgmr.msra.gmra.mxu1 %vm252_vm0, %v4163_v17  ;;  %v121_v40 = vld [vmem:[#allocation5 + $0x38] sm:$0xff] }
  0x5c   :  { %310 = vmatpush1.bf16.msra.mxu1 %v3047_v19  ;;  %329 = vmatprep.mubr.bf16.mxu1 %v4092_v0  ;;  %v3456_v42 = vld [vmem:[#allocation8 + $0x44] ss:$16 sps:$4 sm:$0xff]   ;;  %v3044_v44 = vcombine.high %v117_v38, %v121_v40  ;;  %v3461_v45 = vld [vmem:[#allocation8 + $0x40] ss:$16 sps:$4 sm:$0xff]   ;;  %v3043_v47 = vcombine.low %v117_v38, %v121_v40  ;;  %v4181_v40 = vld [vmem:[#allocation7] sm:$0xff] }
  0x5d   :  { %311 = vmatprep.subr.bf16.mxu1 %v3040_v20  ;;  %2015 = vmatpush1.bf16.msra.mxu0 %v3443_v29  ;;  %v3462_v46 = vld [vmem:[#allocation8 + $0x24] ss:$16 sps:$4 sm:$0xff]   ;;  %v3467_v49 = vld [vmem:[#allocation8 + $0x20] ss:$16 sps:$4 sm:$0xff]  }
  0x5e   :  { %2016 = vmatprep.subr.bf16.mxu0 %v3444_v30  ;;  %v3442_v48 = vld [vmem:[#allocation8 + $0x2e4] ss:$16 sps:$4 sm:$0xff]   ;;  %v3440_v51 = vld [vmem:[#allocation8 + $0x2e0] ss:$16 sps:$4 sm:$0xff]  }
  0x5f   :  { %v3468_v50 = vld [vmem:[#allocation8 + $0x4] ss:$16 sps:$4 sm:$0xff]   ;;  %v3473_v53 = vld [vmem:[#allocation8] ss:$16 sps:$4 sm:$0xff]  }
  0x60   :  { %312 = vmatpush1.bf16.msra.mxu1 %v3039_v25  ;;  %v3448_v52 = vld [vmem:[#allocation8 + $0x2c4] ss:$16 sps:$4 sm:$0xff]   ;;  %v3446_v55 = vld [vmem:[#allocation8 + $0x2c0] ss:$16 sps:$4 sm:$0xff]  }
  0x61   :  { %350 = vmatprep.subr.bf16.mxu1 %v3050_v27  ;;  %2017 = vmatpush1.bf16.msra.mxu0 %v3449_v33  ;;  %v3474_v54 = vld [vmem:[#allocation8 + $0x1e4] ss:$16 sps:$4 sm:$0xff]   ;;  %v3479_v57 = vld [vmem:[#allocation8 + $0x1e0] ss:$16 sps:$4 sm:$0xff]  }
  0x62   :  { %2018 = vmatprep.subr.bf16.mxu0 %v3450_v36  ;;  %v3454_v56 = vld [vmem:[#allocation8 + $0x2a4] ss:$16 sps:$4 sm:$0xff]   ;;  %v3452_v59 = vld [vmem:[#allocation8 + $0x2a0] ss:$16 sps:$4 sm:$0xff]  }
  0x63   :  { %3054 = vmatmul.mubr.msk.bf16.vlgmr.msra.gmra.mxu1 %vm252_vm0, %v4163_v17  ;;  %v3480_v58 = vld [vmem:[#allocation8 + $0x1c4] ss:$16 sps:$4 sm:$0xff]   ;;  %v3485_v61 = vld [vmem:[#allocation8 + $0x1c0] ss:$16 sps:$4 sm:$0xff]  }
  0x64   :  { %351 = vmatpush1.bf16.msra.mxu1 %v3049_v31  ;;  %370 = vmatprep.mubr.bf16.mxu1 %v4092_v0  ;;  %v3460_v60 = vld [vmem:[#allocation8 + $0x284] ss:$16 sps:$4 sm:$0xff]   ;;  %v3458_v63 = vld [vmem:[#allocation8 + $0x280] ss:$16 sps:$4 sm:$0xff]  }
  0x65   :  { %352 = vmatprep.subr.bf16.mxu1 %v3042_v32  ;;  %2019 = vmatpush1.bf16.msra.mxu0 %v3455_v41  ;;  %v3486_v62 = vld [vmem:[#allocation8 + $0x1a4] ss:$16 sps:$4 sm:$0xff]   ;;  %v3491_v1 = vld [vmem:[#allocation8 + $0x1a0] ss:$16 sps:$4 sm:$0xff]  }
  0x66   :  { %2020 = vmatprep.subr.bf16.mxu0 %v3456_v42  ;;  %v3492_v2 = vld [vmem:[#allocation8 + $0x184] ss:$16 sps:$4 sm:$0xff]   ;;  %v3464_v3 = vld [vmem:[#allocation8 + $0x260] ss:$16 sps:$4 sm:$0xff]  }
  0x67   :  { %v3472_v4 = vld [vmem:[#allocation8 + $0x244] ss:$16 sps:$4 sm:$0xff]   ;;  %v3497_v5 = vld [vmem:[#allocation8 + $0x180] ss:$16 sps:$4 sm:$0xff]  }
  0x68   :  { %353 = vmatpush1.bf16.msra.mxu1 %v3041_v37  ;;  %v3498_v6 = vld [vmem:[#allocation8 + $0x164] ss:$16 sps:$4 sm:$0xff]   ;;  %v3470_v7 = vld [vmem:[#allocation8 + $0x240] ss:$16 sps:$4 sm:$0xff]   ;;  %v132_v37 = vlaneseq }
  0x69   :  { %391 = vmatprep.subr.bf16.mxu1 %v3052_v39  ;;  %2021 = vmatpush1.bf16.msra.mxu0 %v3461_v45  ;;  %v3478_v8 = vld [vmem:[#allocation8 + $0x224] ss:$16 sps:$4 sm:$0xff]   ;;  %v3503_v9 = vld [vmem:[#allocation8 + $0x160] ss:$16 sps:$4 sm:$0xff]  }
  0x6a   :  { %2022 = vmatprep.subr.bf16.mxu0 %v3462_v46  ;;  %v3504_v10 = vld [vmem:[#allocation8 + $0x144] ss:$16 sps:$4 sm:$0xff]   ;;  %v3476_v11 = vld [vmem:[#allocation8 + $0x220] ss:$16 sps:$4 sm:$0xff]   ;;  %v4176_v38 = vshrl.u32 %v132_v37, 7 }
  0x6b   :  { %3055 = vmatmul.mubr.msk.bf16.vlgmr.msra.gmra.mxu1 %vm252_vm0, %v4163_v17  ;;  %v3484_v12 = vld [vmem:[#allocation8 + $0x204] ss:$16 sps:$4 sm:$0xff]   ;;  %v3509_v13 = vld [vmem:[#allocation8 + $0x140] ss:$16 sps:$4 sm:$0xff]  }
  0x6c   :  { %392 = vmatpush1.bf16.msra.mxu1 %v3051_v43  ;;  %411 = vmatprep.mubr.bf16.mxu1 %v4092_v0  ;;  %v3466_v0 = vld [vmem:[#allocation8 + $0x264] ss:$16 sps:$4 sm:$0xff]   ;;  %v3482_v14 = vld [vmem:[#allocation8 + $0x200] ss:$16 sps:$4 sm:$0xff]   ;;  %v4179_v39 = vsub.s32 0, %v4176_v38  ;;  %v4184_v41 = vsub.s32 1, %v4176_v38 }
  0x6d   :  { %393 = vmatprep.subr.bf16.mxu1 %v3044_v44  ;;  %2023 = vmatpush1.bf16.msra.mxu0 %v3467_v49  ;;  %v3490_v15 = vld [vmem:[#allocation8 + $0x3e4] ss:$16 sps:$4 sm:$0xff]   ;;  %v3488_v16 = vld [vmem:[#allocation8 + $0x3e0] ss:$16 sps:$4 sm:$0xff]   ;;  %v142_v46 = vsub.s32 2, %v4176_v38 }
  0x6e   :  { %2024 = vmatprep.subr.bf16.mxu0 %v3468_v50  ;;  %v3494_v18 = vld [vmem:[#allocation8 + $0x3c0] ss:$16 sps:$4 sm:$0xff]   ;;  %v3502_v19 = vld [vmem:[#allocation8 + $0x3a4] ss:$16 sps:$4 sm:$0xff]   ;;  %v135_v42 = vrot.slane %v4181_v40, %v4179_v39  ;;  %v139_v43 = vrot.slane %v4181_v40, %v4184_v41  ;;  %v146_v50 = vsub.s32 3, %v4176_v38 }
  0x6f   :  { %v3500_v20 = vld [vmem:[#allocation8 + $0x3a0] ss:$16 sps:$4 sm:$0xff]   ;;  %v3508_v21 = vld [vmem:[#allocation8 + $0x384] ss:$16 sps:$4 sm:$0xff]  }
  0x70   :  { %394 = vmatpush1.bf16.msra.mxu1 %v3043_v47  ;;  %v3506_v22 = vld [vmem:[#allocation8 + $0x380] ss:$16 sps:$4 sm:$0xff]   ;;  %v3510_v23 = vld [vmem:[#allocation8 + $0x124] ss:$16 sps:$4 sm:$0xff]  }
  0x71   :  { %2051 = vmatprep.subr.bf16.mxu1 %v3442_v48  ;;  %2025 = vmatpush1.bf16.msra.mxu0 %v3473_v53  ;;  %v3514_v24 = vld [vmem:[#allocation8 + $0x364] ss:$16 sps:$4 sm:$0xff]   ;;  %v3515_v25 = vld [vmem:[#allocation8 + $0x120] ss:$16 sps:$4 sm:$0xff]   ;;  %v143_v53 = vrot.slane %v4181_v40, %v142_v46 }
  0x72   :  { %2026 = vmatprep.subr.bf16.mxu0 %v3474_v54  ;;  %v3512_v26 = vld [vmem:[#allocation8 + $0x360] ss:$16 sps:$4 sm:$0xff]   ;;  %v3516_v27 = vld [vmem:[#allocation8 + $0x104] ss:$16 sps:$4 sm:$0xff]  }
  0x73   :  { %3056 = vmatmul.mubr.msk.bf16.vlgmr.msra.gmra.mxu1 %vm252_vm0, %v4163_v17  ;;  %v3496_v17 = vld [vmem:[#allocation8 + $0x3c4] ss:$16 sps:$4 sm:$0xff]   ;;  %v3521_v29 = vld [vmem:[#allocation8 + $0x100] ss:$16 sps:$4 sm:$0xff]  }
  0x74   :  { %2052 = vmatpush1.bf16.msra.mxu1 %v3440_v51  ;;  %v3520_v28 = vld [vmem:[#allocation8 + $0x344] ss:$16 sps:$4 sm:$0xff]   ;;  %v3518_v31 = vld [vmem:[#allocation8 + $0x340] ss:$16 sps:$4 sm:$0xff]  }
  0x75   :  { %2053 = vmatprep.subr.bf16.mxu1 %v3448_v52  ;;  %2027 = vmatpush2.bf16.msra.mxu0 %v3479_v57  ;;  %v3527_v30 = vld [vmem:[#allocation8 + $0x4e4] ss:$16 sps:$4 sm:$0xff]   ;;  %v3522_v33 = vld [vmem:[#allocation8 + $0x320] ss:$16 sps:$4 sm:$0xff]  }
  0x76   :  { %2028 = vmatprep.subr.bf16.mxu0 %v3480_v58  ;;  %v3524_v32 = vld [vmem:[#allocation8 + $0x324] ss:$16 sps:$4 sm:$0xff]   ;;  %v3528_v35 = vld [vmem:[#allocation8 + $0x300] ss:$16 sps:$4 sm:$0xff]  }
  0x77   :  { %v3530_v34 = vld [vmem:[#allocation8 + $0x304] ss:$16 sps:$4 sm:$0xff]  }
  0x78   :  { %2054 = vmatpush1.bf16.msra.mxu1 %v3446_v55  ;;  %v3539_v36 = vld [vmem:[#allocation8 + $0x6e4] ss:$16 sps:$4 sm:$0xff]  }
  0x79   :  { %2055 = vmatprep.subr.bf16.mxu1 %v3454_v56  ;;  %2029 = vmatpush2.bf16.msra.mxu0 %v3485_v61  ;;  %v147_v56 = vrot.slane %v4181_v40, %v146_v50 }
  0x7a   :  { %2030 = vmatprep.subr.bf16.mxu0 %v3486_v62 }
  0x7c   :  { %2056 = vmatpush1.bf16.msra.mxu1 %v3452_v59 }
  0x7d   :  { %2057 = vmatprep.subr.bf16.mxu1 %v3460_v60  ;;  %2031 = vmatpush2.bf16.msra.mxu0 %v3491_v1  ;;  %v3525_v60 = vld [vmem:[#allocation8 + $0x4e0] ss:$16 sps:$4 sm:$0xff]  }
  0x7e   :  { %2032 = vmatprep.subr.bf16.mxu0 %v3492_v2 }
  0x80   :  { %2058 = vmatpush1.bf16.msra.mxu1 %v3458_v63  ;;  %v3533_v63 = vld [vmem:[#allocation8 + $0x4c4] ss:$16 sps:$4 sm:$0xff]  }
  0x81   :  { %2059 = vmatprep.subr.bf16.mxu1 %v3466_v0  ;;  %2033 = vmatpush2.bf16.msra.mxu0 %v3497_v5  ;;  %v3531_v5 = vld [vmem:[#allocation8 + $0x4c0] ss:$16 sps:$4 sm:$0xff]  }
  0x82   :  { %2034 = vmatprep.subr.bf16.mxu0 %v3498_v6 }
  0x84   :  { %2060 = vmatpush1.bf16.msra.mxu1 %v3464_v3  ;;  %v154_v3 = vsub.s32 5, %v4176_v38 }
  0x85   :  { %2061 = vmatprep.subr.bf16.mxu1 %v3472_v4  ;;  %2035 = vmatpush2.bf16.msra.mxu0 %v3503_v9 }
  0x86   :  { %2036 = vmatprep.subr.bf16.mxu0 %v3504_v10 }
  0x88   :  { %2062 = vmatpush1.bf16.msra.mxu1 %v3470_v7  ;;  %v3536_v7 = vld [vmem:[#allocation8 + $0x4a4] ss:$16 sps:$4 sm:$0xff]  }
  0x89   :  { %2063 = vmatprep.subr.bf16.mxu1 %v3478_v8  ;;  %2037 = vmatpush2.bf16.msra.mxu0 %v3509_v13  ;;  %v3534_v13 = vld [vmem:[#allocation8 + $0x4a0] ss:$16 sps:$4 sm:$0xff]  }
  0x8a   :  { %2038 = vmatprep.subr.bf16.mxu0 %v3510_v23  ;;  %v3543_v23 = vld [vmem:[#allocation8 + $0x6c0] ss:$16 sps:$4 sm:$0xff]  }
  0x8c   :  { %2064 = vmatpush1.bf16.msra.mxu1 %v3476_v11  ;;  %v155_v11 = vrot.slane %v4181_v40, %v154_v3  ;;  %v3581_v3 = vld [vmem:[#allocation8 + $0x604] ss:$16 sps:$4 sm:$0xff]  }
  0x8d   :  { %2065 = vmatprep.subr.bf16.mxu1 %v3484_v12  ;;  %2039 = vmatpush2.bf16.msra.mxu0 %v3515_v25 }
  0x8e   :  { %2040 = vmatprep.subr.bf16.mxu0 %v3516_v27 }
  0x90   :  { %2066 = vmatpush1.bf16.msra.mxu1 %v3482_v14  ;;  %v3537_v14 = vld [vmem:[#allocation8 + $0x6e0] ss:$16 sps:$4 sm:$0xff]  }
  0x91   :  { %2067 = vmatprep.subr.bf16.mxu1 %v3490_v15  ;;  %2041 = vmatpush2.bf16.msra.mxu0 %v3521_v29 }
  0x92   :  { %2092 = vmatprep.subr.bf16.mxu0 %v3527_v30 }
  0x94   :  { %2068 = vmatpush2.bf16.msra.mxu1 %v3488_v16 }
  0x95   :  { %2069 = vmatprep.subr.bf16.mxu1 %v3496_v17  ;;  %v3542_v17 = vld [vmem:[#allocation8 + $0x484] ss:$16 sps:$4 sm:$0xff]  }
  0x98   :  { %2070 = vmatpush2.bf16.msra.mxu1 %v3494_v18  ;;  %v3545_v18 = vld [vmem:[#allocation8 + $0x6c4] ss:$16 sps:$4 sm:$0xff]  }
  0x99   :  { %2071 = vmatprep.subr.bf16.mxu1 %v3502_v19 }
  0x9c   :  { %2072 = vmatpush2.bf16.msra.mxu1 %v3500_v20 }
  0x9d   :  { %2073 = vmatprep.subr.bf16.mxu1 %v3508_v21  ;;  %v162_v21 = vsub.s32 7, %v4176_v38 }
  0x9f   :  { %v163_v29 = vrot.slane %v4181_v40, %v162_v21  ;;  %v3597_v21 = vld [vmem:[#allocation8 + $0x7a0] ss:$16 sps:$4 sm:$0xff]  }
  0xa0   :  { %2074 = vmatpush2.bf16.msra.mxu1 %v3506_v22  ;;  %v3540_v22 = vld [vmem:[#allocation8 + $0x480] ss:$16 sps:$4 sm:$0xff]  }
  0xa1   :  { %2075 = vmatprep.subr.bf16.mxu1 %v3514_v24  ;;  %v3548_v24 = vld [vmem:[#allocation8 + $0x464] ss:$16 sps:$4 sm:$0xff]  }
  0xa4   :  { %2076 = vmatpush2.bf16.msra.mxu1 %v3512_v26  ;;  %v3551_v26 = vld [vmem:[#allocation8 + $0x6a4] ss:$16 sps:$4 sm:$0xff]  }
  0xa5   :  { %2077 = vmatprep.subr.bf16.mxu1 %v3520_v28 }
  0xa8   :  { %2078 = vmatpush2.bf16.msra.mxu1 %v3518_v31  ;;  %v3546_v31 = vld [vmem:[#allocation8 + $0x460] ss:$16 sps:$4 sm:$0xff]  }
  0xa9   :  { %2079 = vmatprep.subr.bf16.mxu1 %v3524_v32  ;;  %v3549_v32 = vld [vmem:[#allocation8 + $0x6a0] ss:$16 sps:$4 sm:$0xff]  }
  0xac   :  { %2080 = vmatpush2.bf16.msra.mxu1 %v3522_v33 }
  0xad   :  { %2081 = vmatprep.subr.bf16.mxu1 %v3530_v34 }
  0xb0   :  { %2082 = vmatpush2.bf16.msra.mxu1 %v3528_v35  ;;  %v3554_v35 = vld [vmem:[#allocation8 + $0x444] ss:$16 sps:$4 sm:$0xff]  }
  0xb1   :  { %2133 = vmatprep.subr.bf16.mxu1 %v3539_v36  ;;  %v3557_v36 = vld [vmem:[#allocation8 + $0x684] ss:$16 sps:$4 sm:$0xff]  }
 0x11b   :  { %v290_v44 = vpop.f32.mrf.mxu1 }
 0x11c   :  { %v291_v45 = vadd.f32 %v290_v44, %v135_v42  ;;  %v3555_v44 = vld [vmem:[#allocation8 + $0x680] ss:$16 sps:$4 sm:$0xff]  }
 0x11d   :  { %v292_v47 = vpop.f32.mrf.mxu1 }
 0x11e   :  { %vm420_vm1 = vcmp.gt.f32.partialorder %v291_v45, 0.0  ;;  %v428_v48 = vmul.f32 0.01, %v291_v45  ;;  %v293_v49 = vadd.f32 %v292_v47, %v139_v43  ;;  %v3552_v43 = vld [vmem:[#allocation8 + $0x440] ss:$16 sps:$4 sm:$0xff]  }
 0x11f   :  { %v294_v51 = vpop.f32.mrf.mxu1 }
 0x120   :  { %v429_v52 = vmul.f32 0.01, %v293_v49  ;;  %vm421_vm2 = vcmp.gt.f32.partialorder %v293_v49, 0.0  ;;  %v436_v55 = vsel %vm420_vm1, %v291_v45, %v428_v48  ;;  %v3560_v45 = vld [vmem:[#allocation8 + $0x424] ss:$16 sps:$4 sm:$0xff]  }
 0x121   :  { %v295_v54 = vpop.f32.mrf.mxu1  ;;  %v4200_v62 = vpack.c.bf16 %v436_v55, %v436_v55  ;;  %v3563_v48 = vld [vmem:[#allocation8 + $0x664] ss:$16 sps:$4 sm:$0xff]  }
 0x122   :  { %v437_v57 = vsel %vm421_vm2, %v293_v49, %v429_v52  ;;  %v3561_v54 = vld [vmem:[#allocation8 + $0x660] ss:$16 sps:$4 sm:$0xff]  }
 0x123   :  { %v331_v58 = vpop.f32.mrf.mxu1  ;;  %v4198_v59 = vpack.c.bf16 %v437_v57, %v437_v57  ;;  %v3569_v57 = vld [vmem:[#allocation8 + $0x644] ss:$16 sps:$4 sm:$0xff]  }
 0x124   :  { %v332_v61 = vadd.f32 %v331_v58, %v143_v53  ;;  %v3558_v53 = vld [vmem:[#allocation8 + $0x420] ss:$16 sps:$4 sm:$0xff]  }
 0x125   :  { %v333_v0 = vpop.f32.mrf.mxu1  ;;  %2042 = vmatprep.mubr.bf16.mxu0 %v4198_v59  ;;  %v3564_v58 = vld [vmem:[#allocation8 + $0x400] ss:$16 sps:$4 sm:$0xff]  }
 0x126   :  { %vm422_vm3 = vcmp.gt.f32.partialorder %v332_v61, 0.0  ;;  %v430_v1 = vmul.f32 0.01, %v332_v61  ;;  %v334_v2 = vadd.f32 %v333_v0, %v147_v56  ;;  %2043 = vmatmul.mubr.bf16.vlgmr.msra.gmra.mxu0 %v4200_v62  ;;  %v3566_v56 = vld [vmem:[#allocation8 + $0x404] ss:$16 sps:$4 sm:$0xff]  }
 0x127   :  { %2093 = vmatpush1.bf16.msra.mxu0 %v3525_v60  ;;  %v335_v4 = vpop.f32.mrf.mxu1  ;;  %v3567_v60 = vld [vmem:[#allocation8 + $0x640] ss:$16 sps:$4 sm:$0xff]  }
 0x128   :  { %vm423_vm4 = vcmp.gt.f32.partialorder %v334_v2, 0.0  ;;  %v431_v6 = vmul.f32 0.01, %v334_v2  ;;  %2094 = vmatprep.subr.bf16.mxu0 %v3533_v63  ;;  %v438_v8 = vsel %vm422_vm3, %v332_v61, %v430_v1  ;;  %v3572_v61 = vld [vmem:[#allocation8 + $0x5e4] ss:$16 sps:$4 sm:$0xff]  }
 0x129   :  { %v336_v9 = vpop.f32.mrf.mxu1  ;;  %v4210_v16 = vpack.c.bf16 %v438_v8, %v438_v8  ;;  %v3575_v63 = vld [vmem:[#allocation8 + $0x624] ss:$16 sps:$4 sm:$0xff]   ;;  %v3570_v0 = vld [vmem:[#allocation8 + $0x5e0] ss:$16 sps:$4 sm:$0xff]  }
 0x12a   :  { %v439_v10 = vsel %vm423_vm4, %v334_v2, %v431_v6  ;;  %v3573_v1 = vld [vmem:[#allocation8 + $0x620] ss:$16 sps:$4 sm:$0xff]   ;;  %v3578_v2 = vld [vmem:[#allocation8 + $0x5c4] ss:$16 sps:$4 sm:$0xff]  }
 0x12b   :  { %2095 = vmatpush1.bf16.msra.mxu0 %v3531_v5  ;;  %v4206_v12 = vpack.c.bf16 %v439_v10, %v439_v10  ;;  %v4208_v15 = vpop.f32.mrf.mxu1  ;;  %v3576_v4 = vld [vmem:[#allocation8 + $0x5c0] ss:$16 sps:$4 sm:$0xff]   ;;  %v3584_v6 = vld [vmem:[#allocation8 + $0x5a4] ss:$16 sps:$4 sm:$0xff]  }
 0x12c   :  { %2096 = vmatprep.subr.bf16.mxu0 %v3536_v7  ;;  %v3579_v5 = vld [vmem:[#allocation8 + $0x600] ss:$16 sps:$4 sm:$0xff]   ;;  %v3587_v7 = vld [vmem:[#allocation8 + $0x7e4] ss:$16 sps:$4 sm:$0xff]  }
 0x12d   :  { %2083 = vmatprep.mubr.bf16.mxu1 %v4206_v12  ;;  %v374_v19 = vpop.f32.mrf.mxu1  ;;  %v3582_v8 = vld [vmem:[#allocation8 + $0x5a0] ss:$16 sps:$4 sm:$0xff]   ;;  %v3590_v10 = vld [vmem:[#allocation8 + $0x584] ss:$16 sps:$4 sm:$0xff]  }
 0x12e   :  { %2084 = vmatmul.mubr.bf16.vlgmr.msra.gmra.mxu1 %v4210_v16  ;;  %v375_v20 = vadd.f32 %v374_v19, %v155_v11  ;;  %v3585_v9 = vld [vmem:[#allocation8 + $0x7e0] ss:$16 sps:$4 sm:$0xff]   ;;  %v3593_v11 = vld [vmem:[#allocation8 + $0x7c4] ss:$16 sps:$4 sm:$0xff]   ;;  %v150_v19 = vsub.s32 4, %v4176_v38 }
 0x12f   :  { %2097 = vmatpush1.bf16.msra.mxu0 %v3534_v13  ;;  %2134 = vmatpush1.bf16.msra.mxu1 %v3537_v14  ;;  %v376_v25 = vpop.f32.mrf.mxu1  ;;  %v3588_v13 = vld [vmem:[#allocation8 + $0x580] ss:$16 sps:$4 sm:$0xff]  }
 0x130   :  { %2098 = vmatprep.subr.bf16.mxu0 %v3542_v17  ;;  %2135 = vmatprep.subr.bf16.mxu1 %v3545_v18  ;;  %vm425_vm5 = vcmp.gt.f32.partialorder %v375_v20, 0.0  ;;  %v433_v27 = vmul.f32 0.01, %v375_v20  ;;  %v3591_v14 = vld [vmem:[#allocation8 + $0x7c0] ss:$16 sps:$4 sm:$0xff]  }
 0x131   :  { %v377_v28 = vpop.f32.mrf.mxu1  ;;  %v3596_v17 = vld [vmem:[#allocation8 + $0x564] ss:$16 sps:$4 sm:$0xff]   ;;  %v3600_v25 = vld [vmem:[#allocation8 + $0x540] ss:$16 sps:$4 sm:$0xff]  }
 0x132   :  { %v441_v30 = vsel %vm425_vm5, %v375_v20, %v433_v27  ;;  %v3599_v18 = vld [vmem:[#allocation8 + $0x7a4] ss:$16 sps:$4 sm:$0xff]   ;;  %v3594_v20 = vld [vmem:[#allocation8 + $0x560] ss:$16 sps:$4 sm:$0xff]  }
 0x133   :  { %2099 = vmatpush1.bf16.msra.mxu0 %v3540_v22  ;;  %2136 = vmatpush1.bf16.msra.mxu1 %v3543_v23  ;;  %v4216_v33 = vpop.f32.mrf.mxu1  ;;  %v4218_v34 = vpack.c.bf16 %v441_v30, %v441_v30  ;;  %v3602_v22 = vld [vmem:[#allocation8 + $0x544] ss:$16 sps:$4 sm:$0xff]   ;;  %v158_v30 = vsub.s32 6, %v4176_v38 }
 0x134   :  { %2100 = vmatprep.subr.bf16.mxu0 %v3548_v24  ;;  %2137 = vmatprep.subr.bf16.mxu1 %v3551_v26  ;;  %v3605_v23 = vld [vmem:[#allocation8 + $0x784] ss:$16 sps:$4 sm:$0xff]   ;;  %v151_v24 = vrot.slane %v4181_v40, %v150_v19  ;;  %v3603_v26 = vld [vmem:[#allocation8 + $0x780] ss:$16 sps:$4 sm:$0xff]   ;;  %v3665_v19 = vld [vmem:[#allocation8 + $0x24c] ss:$16 sps:$4 sm:$0xff]  }
 0x135   :  { %v415_v37 = vpop.f32.mrf.mxu1  ;;  %2124 = vmatprep.mubr.bf16.mxu0 %v4218_v34  ;;  %v3608_v27 = vld [vmem:[#allocation8 + $0x524] ss:$16 sps:$4 sm:$0xff]  }
 0x136   :  { %v416_v42 = vadd.f32 %v415_v37, %v163_v29  ;;  %v3611_v28 = vld [vmem:[#allocation8 + $0x764] ss:$16 sps:$4 sm:$0xff]   ;;  %v373_v29 = vadd.f32 %v4208_v15, %v151_v24  ;;  %v3666_v24 = vld [vmem:[#allocation8 + $0x1e8] ss:$16 sps:$4 sm:$0xff]  }
 0x137   :  { %2101 = vmatpush1.bf16.msra.mxu0 %v3546_v31  ;;  %2138 = vmatpush1.bf16.msra.mxu1 %v3549_v32  ;;  %v417_v47 = vpop.f32.mrf.mxu1  ;;  %v3606_v31 = vld [vmem:[#allocation8 + $0x520] ss:$16 sps:$4 sm:$0xff]   ;;  %v3620_v15 = vld [vmem:[#allocation8 + $0x724] ss:$16 sps:$4 sm:$0xff]  }
 0x138   :  { %2102 = vmatprep.subr.bf16.mxu0 %v3554_v35  ;;  %2139 = vmatprep.subr.bf16.mxu1 %v3557_v36  ;;  %vm427_vm6 = vcmp.gt.f32.partialorder %v416_v42, 0.0  ;;  %v435_v49 = vmul.f32 0.01, %v416_v42  ;;  %v3609_v32 = vld [vmem:[#allocation8 + $0x760] ss:$16 sps:$4 sm:$0xff]   ;;  %vm424_vm7 = vcmp.gt.f32.partialorder %v373_v29, 0.0 }
 0x139   :  { %v418_v51 = vpop.f32.mrf.mxu1  ;;  %v3614_v35 = vld [vmem:[#allocation8 + $0x504] ss:$16 sps:$4 sm:$0xff]   ;;  %v432_v37 = vmul.f32 0.01, %v373_v29 }
 0x13a   :  { %v443_v52 = vsel %vm427_vm6, %v416_v42, %v435_v49  ;;  %v3617_v36 = vld [vmem:[#allocation8 + $0x744] ss:$16 sps:$4 sm:$0xff]   ;;  %v159_v42 = vrot.slane %v4181_v40, %v158_v30  ;;  %v3618_v49 = vld [vmem:[#allocation8 + $0x720] ss:$16 sps:$4 sm:$0xff]   ;;  %v3621_v51 = vld [vmem:[#allocation8 + $0xe8] ss:$16 sps:$4 sm:$0xff]  }
 0x13b   :  { %2103 = vmatpush1.bf16.msra.mxu0 %v3552_v43  ;;  %2140 = vmatpush1.bf16.msra.mxu1 %v3555_v44  ;;  %v4221_v55 = vpack.c.bf16 %v443_v52, %v443_v52  ;;  %v3612_v43 = vld [vmem:[#allocation8 + $0x500] ss:$16 sps:$4 sm:$0xff]   ;;  %v440_v47 = vsel %vm424_vm7, %v373_v29, %v432_v37  ;;  %v3626_v40 = vld [vmem:[#allocation8 + $0x704] ss:$16 sps:$4 sm:$0xff]   ;;  %v3675_v29 = vld [vmem:[#allocation8 + $0x208] ss:$16 sps:$4 sm:$0xff]  }
 0x13c   :  { %2104 = vmatprep.subr.bf16.mxu0 %v3560_v45  ;;  %2141 = vmatprep.subr.bf16.mxu1 %v3563_v48  ;;  %v3615_v44 = vld [vmem:[#allocation8 + $0x740] ss:$16 sps:$4 sm:$0xff]   ;;  %v3623_v45 = vld [vmem:[#allocation8 + $0xec] ss:$16 sps:$4 sm:$0xff]   ;;  %v414_v48 = vadd.f32 %v4216_v33, %v159_v42  ;;  %v4230_v52 = vpack.c.bf16 %v440_v47, %v440_v47  ;;  %v3684_v42 = vld [vmem:[#allocation8 + $0x188] ss:$16 sps:$4 sm:$0xff]  }
 0x13d   :  { %2165 = vmatprep.mubr.bf16.mxu1 %v4221_v55  ;;  %v3632_v33 = vld [vmem:[#allocation8 + $0xac] ss:$16 sps:$4 sm:$0xff]   ;;  %v3693_v47 = vld [vmem:[#allocation8 + $0x3a8] ss:$16 sps:$4 sm:$0xff]  }
 0x13e   :  { %vm426_vm8 = vcmp.gt.f32.partialorder %v414_v48, 0.0  ;;  %v3680_v30 = vld [vmem:[#allocation8 + $0x1ac] ss:$16 sps:$4 sm:$0xff]  }
 0x13f   :  { %2105 = vmatpush1.bf16.msra.mxu0 %v3558_v53  ;;  %2142 = vmatpush1.bf16.msra.mxu1 %v3561_v54  ;;  %v434_v53 = vmul.f32 0.01, %v414_v48  ;;  %v3629_v54 = vld [vmem:[#allocation8 + $0xcc] ss:$16 sps:$4 sm:$0xff]  }
 0x140   :  { %2106 = vmatprep.subr.bf16.mxu0 %v3566_v56  ;;  %2143 = vmatprep.subr.bf16.mxu1 %v3569_v57  ;;  %v3624_v56 = vld [vmem:[#allocation8 + $0x700] ss:$16 sps:$4 sm:$0xff]   ;;  %v3627_v57 = vld [vmem:[#allocation8 + $0xc8] ss:$16 sps:$4 sm:$0xff]   ;;  %v3689_v37 = vld [vmem:[#allocation8 + $0x3cc] ss:$16 sps:$4 sm:$0xff]  }
 0x143   :  { %2107 = vmatpush1.bf16.msra.mxu0 %v3564_v58  ;;  %2144 = vmatpush1.bf16.msra.mxu1 %v3567_v60  ;;  %v3635_v58 = vld [vmem:[#allocation8 + $0x2ec] ss:$16 sps:$4 sm:$0xff]   ;;  %v442_v60 = vsel %vm426_vm8, %v414_v48, %v434_v53 }
 0x144   :  { %2108 = vmatprep.subr.bf16.mxu0 %v3572_v61  ;;  %2145 = vmatprep.subr.bf16.mxu1 %v3575_v63  ;;  %v3630_v61 = vld [vmem:[#allocation8 + $0xa8] ss:$16 sps:$4 sm:$0xff]   ;;  %v3698_v48 = vld [vmem:[#allocation8 + $0x14c] ss:$16 sps:$4 sm:$0xff]  }
 0x145   :  { %v3633_v63 = vld [vmem:[#allocation8 + $0x2e8] ss:$16 sps:$4 sm:$0xff]   ;;  %v3704_v53 = vld [vmem:[#allocation8 + $0x12c] ss:$16 sps:$4 sm:$0xff]  }
 0x147   :  { %2109 = vmatpush2.bf16.msra.mxu0 %v3570_v0  ;;  %2146 = vmatpush1.bf16.msra.mxu1 %v3573_v1  ;;  %v4234_v0 = vpack.c.bf16 %v442_v60, %v442_v60  ;;  %v3638_v1 = vld [vmem:[#allocation8 + $0x8c] ss:$16 sps:$4 sm:$0xff]   ;;  %v3708_v60 = vld [vmem:[#allocation8 + $0x108] ss:$16 sps:$4 sm:$0xff]  }
 0x148   :  { %2110 = vmatprep.subr.bf16.mxu0 %v3578_v2  ;;  %2147 = vmatprep.subr.bf16.mxu1 %v3581_v3  ;;  %v3641_v2 = vld [vmem:[#allocation8 + $0x2cc] ss:$16 sps:$4 sm:$0xff]   ;;  %v3639_v3 = vld [vmem:[#allocation8 + $0x2c8] ss:$16 sps:$4 sm:$0xff]  }
 0x14b   :  { %2111 = vmatpush2.bf16.msra.mxu0 %v3576_v4  ;;  %2148 = vmatpush1.bf16.msra.mxu1 %v3579_v5  ;;  %v3644_v4 = vld [vmem:[#allocation8 + $0x6c] ss:$16 sps:$4 sm:$0xff]  }
 0x14c   :  { %2112 = vmatprep.subr.bf16.mxu0 %v3584_v6  ;;  %2149 = vmatprep.subr.bf16.mxu1 %v3587_v7  ;;  %v3647_v5 = vld [vmem:[#allocation8 + $0x2ac] ss:$16 sps:$4 sm:$0xff]   ;;  %v3642_v6 = vld [vmem:[#allocation8 + $0x68] ss:$16 sps:$4 sm:$0xff]  }
 0x14d   :  { %v3645_v7 = vld [vmem:[#allocation8 + $0x2a8] ss:$16 sps:$4 sm:$0xff]  }
 0x14f   :  { %2113 = vmatpush2.bf16.msra.mxu0 %v3582_v8  ;;  %2150 = vmatpush2.bf16.msra.mxu1 %v3585_v9  ;;  %v3650_v8 = vld [vmem:[#allocation8 + $0x4c] ss:$16 sps:$4 sm:$0xff]  }
 0x150   :  { %2114 = vmatprep.subr.bf16.mxu0 %v3590_v10  ;;  %2151 = vmatprep.subr.bf16.mxu1 %v3593_v11  ;;  %v3653_v9 = vld [vmem:[#allocation8 + $0x28c] ss:$16 sps:$4 sm:$0xff]   ;;  %v3648_v10 = vld [vmem:[#allocation8 + $0x48] ss:$16 sps:$4 sm:$0xff]  }
 0x151   :  { %v3651_v11 = vld [vmem:[#allocation8 + $0x288] ss:$16 sps:$4 sm:$0xff]  }
 0x153   :  { %2115 = vmatpush2.bf16.msra.mxu0 %v3588_v13  ;;  %2152 = vmatpush2.bf16.msra.mxu1 %v3591_v14  ;;  %v3656_v13 = vld [vmem:[#allocation8 + $0x2c] ss:$16 sps:$4 sm:$0xff]   ;;  %v3654_v14 = vld [vmem:[#allocation8 + $0x28] ss:$16 sps:$4 sm:$0xff]  }
 0x154   :  { %2116 = vmatprep.subr.bf16.mxu0 %v3596_v17  ;;  %2153 = vmatprep.subr.bf16.mxu1 %v3599_v18  ;;  %v3657_v17 = vld [vmem:[#allocation8 + $0x268] ss:$16 sps:$4 sm:$0xff]   ;;  %v3662_v18 = vld [vmem:[#allocation8 + $0xc] ss:$16 sps:$4 sm:$0xff]  }
 0x157   :  { %2117 = vmatpush2.bf16.msra.mxu0 %v3594_v20  ;;  %2154 = vmatpush2.bf16.msra.mxu1 %v3597_v21  ;;  %v3660_v20 = vld [vmem:[#allocation8 + $0x8] ss:$16 sps:$4 sm:$0xff]  }
 0x158   :  { %2118 = vmatprep.subr.bf16.mxu0 %v3602_v22  ;;  %2155 = vmatprep.subr.bf16.mxu1 %v3605_v23  ;;  %v3663_v21 = vld [vmem:[#allocation8 + $0x248] ss:$16 sps:$4 sm:$0xff]   ;;  %v3668_v22 = vld [vmem:[#allocation8 + $0x1ec] ss:$16 sps:$4 sm:$0xff]  }
 0x159   :  { %v3671_v23 = vld [vmem:[#allocation8 + $0x22c] ss:$16 sps:$4 sm:$0xff]  }
 0x15b   :  { %2119 = vmatpush2.bf16.msra.mxu0 %v3600_v25  ;;  %2156 = vmatpush2.bf16.msra.mxu1 %v3603_v26  ;;  %v3669_v25 = vld [vmem:[#allocation8 + $0x228] ss:$16 sps:$4 sm:$0xff]   ;;  %v3674_v26 = vld [vmem:[#allocation8 + $0x1cc] ss:$16 sps:$4 sm:$0xff]  }
 0x15c   :  { %2120 = vmatprep.subr.bf16.mxu0 %v3608_v27  ;;  %2157 = vmatprep.subr.bf16.mxu1 %v3611_v28  ;;  %v3677_v27 = vld [vmem:[#allocation8 + $0x20c] ss:$16 sps:$4 sm:$0xff]   ;;  %v3672_v28 = vld [vmem:[#allocation8 + $0x1c8] ss:$16 sps:$4 sm:$0xff]  }
 0x15f   :  { %2121 = vmatpush2.bf16.msra.mxu0 %v3606_v31  ;;  %2158 = vmatpush2.bf16.msra.mxu1 %v3609_v32  ;;  %v3683_v31 = vld [vmem:[#allocation8 + $0x3ec] ss:$16 sps:$4 sm:$0xff]   ;;  %v3678_v32 = vld [vmem:[#allocation8 + $0x1a8] ss:$16 sps:$4 sm:$0xff]  }
 0x160   :  { %2122 = vmatprep.subr.bf16.mxu0 %v3614_v35  ;;  %2159 = vmatprep.subr.bf16.mxu1 %v3617_v36  ;;  %v3681_v35 = vld [vmem:[#allocation8 + $0x3e8] ss:$16 sps:$4 sm:$0xff]   ;;  %v3686_v36 = vld [vmem:[#allocation8 + $0x18c] ss:$16 sps:$4 sm:$0xff]  }
 0x163   :  { %2123 = vmatpush2.bf16.msra.mxu0 %v3612_v43  ;;  %2160 = vmatpush2.bf16.msra.mxu1 %v3615_v44  ;;  %v3687_v43 = vld [vmem:[#allocation8 + $0x3c8] ss:$16 sps:$4 sm:$0xff]   ;;  %v3692_v44 = vld [vmem:[#allocation8 + $0x16c] ss:$16 sps:$4 sm:$0xff]  }
 0x164   :  { %2161 = vmatprep.subr.bf16.mxu1 %v3620_v15  ;;  %2174 = vmatprep.subr.bf16.mxu0 %v3623_v45  ;;  %v3695_v15 = vld [vmem:[#allocation8 + $0x3ac] ss:$16 sps:$4 sm:$0xff]   ;;  %v3690_v45 = vld [vmem:[#allocation8 + $0x168] ss:$16 sps:$4 sm:$0xff]  }
 0x166   :  { %2125 = vmatmul.mubr.bf16.vlgmr.msra.gmra.mxu0 %v4230_v52 }
 0x167   :  { %2162 = vmatpush2.bf16.msra.mxu1 %v3618_v49  ;;  %2175 = vmatpush1.bf16.msra.mxu0 %v3621_v51  ;;  %v3701_v49 = vld [vmem:[#allocation8 + $0x38c] ss:$16 sps:$4 sm:$0xff]   ;;  %v3696_v51 = vld [vmem:[#allocation8 + $0x148] ss:$16 sps:$4 sm:$0xff]  }
 0x168   :  { %2206 = vmatprep.mubr.bf16.mxu0 %v4198_v59  ;;  %2163 = vmatprep.subr.bf16.mxu1 %v3626_v40  ;;  %v3636_v59 = vld [vmem:[#allocation8 + $0x88] ss:$16 sps:$4 sm:$0xff]  }
 0x169   :  { %2176 = vmatprep.subr.bf16.mxu0 %v3629_v54  ;;  %v3699_v40 = vld [vmem:[#allocation8 + $0x388] ss:$16 sps:$4 sm:$0xff]   ;;  %v3707_v54 = vld [vmem:[#allocation8 + $0x36c] ss:$16 sps:$4 sm:$0xff]  }
 0x16b   :  { %2164 = vmatpush2.bf16.msra.mxu1 %v3624_v56  ;;  %2177 = vmatpush1.bf16.msra.mxu0 %v3627_v57  ;;  %v3702_v56 = vld [vmem:[#allocation8 + $0x128] ss:$16 sps:$4 sm:$0xff]  }
 0x16c   :  { %2178 = vmatprep.subr.bf16.mxu0 %v3632_v33  ;;  %2215 = vmatprep.subr.bf16.mxu1 %v3635_v58  ;;  %v3705_v57 = vld [vmem:[#allocation8 + $0x368] ss:$16 sps:$4 sm:$0xff]   ;;  %v3710_v33 = vld [vmem:[#allocation8 + $0x10c] ss:$16 sps:$4 sm:$0xff]  }
 0x16d   :  { %v3713_v58 = vld [vmem:[#allocation8 + $0x34c] ss:$16 sps:$4 sm:$0xff]  }
 0x16e   :  { %2166 = vmatmul.mubr.bf16.vlgmr.msra.gmra.mxu1 %v4234_v0 }
 0x16f   :  { %2179 = vmatpush1.bf16.msra.mxu0 %v3630_v61  ;;  %2216 = vmatpush1.bf16.msra.mxu1 %v3633_v63  ;;  %v3711_v61 = vld [vmem:[#allocation8 + $0x348] ss:$16 sps:$4 sm:$0xff]   ;;  %v3716_v63 = vld [vmem:[#allocation8 + $0x32c] ss:$16 sps:$4 sm:$0xff]  }
 0x170   :  { %2247 = vmatprep.mubr.bf16.mxu1 %v4206_v12  ;;  %2180 = vmatprep.subr.bf16.mxu0 %v3638_v1  ;;  %v3659_v12 = vld [vmem:[#allocation8 + $0x26c] ss:$16 sps:$4 sm:$0xff]  }
 0x171   :  { %2217 = vmatprep.subr.bf16.mxu1 %v3641_v2  ;;  %v3719_v1 = vld [vmem:[#allocation8 + $0x4ec] ss:$16 sps:$4 sm:$0xff]   ;;  %v3714_v2 = vld [vmem:[#allocation8 + $0x328] ss:$16 sps:$4 sm:$0xff]  }
 0x173   :  { %2181 = vmatpush1.bf16.msra.mxu0 %v3636_v59  ;;  %2218 = vmatpush1.bf16.msra.mxu1 %v3639_v3  ;;  %v3717_v59 = vld [vmem:[#allocation8 + $0x4e8] ss:$16 sps:$4 sm:$0xff]   ;;  %v3722_v3 = vld [vmem:[#allocation8 + $0x30c] ss:$16 sps:$4 sm:$0xff]  }
 0x174   :  { %2182 = vmatprep.subr.bf16.mxu0 %v3644_v4  ;;  %2219 = vmatprep.subr.bf16.mxu1 %v3647_v5  ;;  %v3725_v4 = vld [vmem:[#allocation8 + $0x4cc] ss:$16 sps:$4 sm:$0xff]   ;;  %v3720_v5 = vld [vmem:[#allocation8 + $0x308] ss:$16 sps:$4 sm:$0xff]  }
 0x177   :  { %2183 = vmatpush1.bf16.msra.mxu0 %v3642_v6  ;;  %2220 = vmatpush1.bf16.msra.mxu1 %v3645_v7  ;;  %v3723_v6 = vld [vmem:[#allocation8 + $0x4c8] ss:$16 sps:$4 sm:$0xff]   ;;  %v3728_v7 = vld [vmem:[#allocation8 + $0x4ac] ss:$16 sps:$4 sm:$0xff]  }
 0x178   :  { %2184 = vmatprep.subr.bf16.mxu0 %v3650_v8  ;;  %2221 = vmatprep.subr.bf16.mxu1 %v3653_v9  ;;  %v3731_v8 = vld [vmem:[#allocation8 + $0x6ec] ss:$16 sps:$4 sm:$0xff]   ;;  %v3726_v9 = vld [vmem:[#allocation8 + $0x4a8] ss:$16 sps:$4 sm:$0xff]  }
 0x17b   :  { %2185 = vmatpush1.bf16.msra.mxu0 %v3648_v10  ;;  %2222 = vmatpush1.bf16.msra.mxu1 %v3651_v11  ;;  %v3729_v10 = vld [vmem:[#allocation8 + $0x6e8] ss:$16 sps:$4 sm:$0xff]   ;;  %v3734_v11 = vld [vmem:[#allocation8 + $0x48c] ss:$16 sps:$4 sm:$0xff]  }
 0x17c   :  { %2186 = vmatprep.subr.bf16.mxu0 %v3656_v13  ;;  %2223 = vmatprep.subr.bf16.mxu1 %v3659_v12  ;;  %v3737_v13 = vld [vmem:[#allocation8 + $0x6cc] ss:$16 sps:$4 sm:$0xff]   ;;  %v3735_v12 = vld [vmem:[#allocation8 + $0x6c8] ss:$16 sps:$4 sm:$0xff]  }
 0x17f   :  { %2187 = vmatpush1.bf16.msra.mxu0 %v3654_v14  ;;  %2224 = vmatpush1.bf16.msra.mxu1 %v3657_v17  ;;  %v3743_v14 = vld [vmem:[#allocation8 + $0x6ac] ss:$16 sps:$4 sm:$0xff]   ;;  %v3738_v17 = vld [vmem:[#allocation8 + $0x468] ss:$16 sps:$4 sm:$0xff]  }
 0x180   :  { %2188 = vmatprep.subr.bf16.mxu0 %v3662_v18  ;;  %2225 = vmatprep.subr.bf16.mxu1 %v3665_v19  ;;  %v3741_v18 = vld [vmem:[#allocation8 + $0x6a8] ss:$16 sps:$4 sm:$0xff]   ;;  %v3746_v19 = vld [vmem:[#allocation8 + $0x44c] ss:$16 sps:$4 sm:$0xff]  }
 0x183   :  { %2189 = vmatpush1.bf16.msra.mxu0 %v3660_v20  ;;  %2226 = vmatpush1.bf16.msra.mxu1 %v3663_v21  ;;  %v3749_v20 = vld [vmem:[#allocation8 + $0x68c] ss:$16 sps:$4 sm:$0xff]   ;;  %v3747_v21 = vld [vmem:[#allocation8 + $0x688] ss:$16 sps:$4 sm:$0xff]  }
 0x184   :  { %2190 = vmatprep.subr.bf16.mxu0 %v3668_v22  ;;  %2227 = vmatprep.subr.bf16.mxu1 %v3671_v23  ;;  %v3752_v22 = vld [vmem:[#allocation8 + $0x42c] ss:$16 sps:$4 sm:$0xff]   ;;  %v3750_v23 = vld [vmem:[#allocation8 + $0x428] ss:$16 sps:$4 sm:$0xff]  }
 0x187   :  { %2191 = vmatpush2.bf16.msra.mxu0 %v3666_v24  ;;  %2228 = vmatpush1.bf16.msra.mxu1 %v3669_v25  ;;  %v3753_v24 = vld [vmem:[#allocation8 + $0x668] ss:$16 sps:$4 sm:$0xff]   ;;  %v3758_v25 = vld [vmem:[#allocation8 + $0x40c] ss:$16 sps:$4 sm:$0xff]  }
 0x188   :  { %2192 = vmatprep.subr.bf16.mxu0 %v3674_v26  ;;  %2229 = vmatprep.subr.bf16.mxu1 %v3677_v27  ;;  %v3761_v26 = vld [vmem:[#allocation8 + $0x64c] ss:$16 sps:$4 sm:$0xff]   ;;  %v3756_v27 = vld [vmem:[#allocation8 + $0x408] ss:$16 sps:$4 sm:$0xff]  }
 0x18b   :  { %2193 = vmatpush2.bf16.msra.mxu0 %v3672_v28  ;;  %2230 = vmatpush1.bf16.msra.mxu1 %v3675_v29  ;;  %v3759_v28 = vld [vmem:[#allocation8 + $0x648] ss:$16 sps:$4 sm:$0xff]   ;;  %v3764_v29 = vld [vmem:[#allocation8 + $0x5ec] ss:$16 sps:$4 sm:$0xff]  }
 0x18c   :  { %2194 = vmatprep.subr.bf16.mxu0 %v3680_v30  ;;  %2231 = vmatprep.subr.bf16.mxu1 %v3683_v31  ;;  %v3767_v30 = vld [vmem:[#allocation8 + $0x62c] ss:$16 sps:$4 sm:$0xff]   ;;  %v3762_v31 = vld [vmem:[#allocation8 + $0x5e8] ss:$16 sps:$4 sm:$0xff]  }
 0x18f   :  { %2195 = vmatpush2.bf16.msra.mxu0 %v3678_v32  ;;  %2232 = vmatpush2.bf16.msra.mxu1 %v3681_v35  ;;  %v3765_v32 = vld [vmem:[#allocation8 + $0x628] ss:$16 sps:$4 sm:$0xff]   ;;  %v3770_v35 = vld [vmem:[#allocation8 + $0x5cc] ss:$16 sps:$4 sm:$0xff]  }
 0x190   :  { %2196 = vmatprep.subr.bf16.mxu0 %v3686_v36  ;;  %2233 = vmatprep.subr.bf16.mxu1 %v3689_v37  ;;  %v3773_v36 = vld [vmem:[#allocation8 + $0x60c] ss:$16 sps:$4 sm:$0xff]   ;;  %v3768_v37 = vld [vmem:[#allocation8 + $0x5c8] ss:$16 sps:$4 sm:$0xff]  }
 0x193   :  { %2197 = vmatpush2.bf16.msra.mxu0 %v3684_v42  ;;  %2234 = vmatpush2.bf16.msra.mxu1 %v3687_v43  ;;  %v3771_v42 = vld [vmem:[#allocation8 + $0x608] ss:$16 sps:$4 sm:$0xff]   ;;  %v3776_v43 = vld [vmem:[#allocation8 + $0x5ac] ss:$16 sps:$4 sm:$0xff]  }
 0x194   :  { %2198 = vmatprep.subr.bf16.mxu0 %v3692_v44  ;;  %2235 = vmatprep.subr.bf16.mxu1 %v3695_v15  ;;  %v3779_v44 = vld [vmem:[#allocation8 + $0x7ec] ss:$16 sps:$4 sm:$0xff]   ;;  %v3774_v15 = vld [vmem:[#allocation8 + $0x5a8] ss:$16 sps:$4 sm:$0xff]  }
 0x197   :  { %2199 = vmatpush2.bf16.msra.mxu0 %v3690_v45  ;;  %2236 = vmatpush2.bf16.msra.mxu1 %v3693_v47  ;;  %v3777_v45 = vld [vmem:[#allocation8 + $0x7e8] ss:$16 sps:$4 sm:$0xff]   ;;  %v3782_v47 = vld [vmem:[#allocation8 + $0x58c] ss:$16 sps:$4 sm:$0xff]  }
 0x198   :  { %2200 = vmatprep.subr.bf16.mxu0 %v3698_v48  ;;  %2237 = vmatprep.subr.bf16.mxu1 %v3701_v49  ;;  %v3785_v48 = vld [vmem:[#allocation8 + $0x7cc] ss:$16 sps:$4 sm:$0xff]   ;;  %v3780_v49 = vld [vmem:[#allocation8 + $0x588] ss:$16 sps:$4 sm:$0xff]  }
 0x19b   :  { %2201 = vmatpush2.bf16.msra.mxu0 %v3696_v51  ;;  %2238 = vmatpush2.bf16.msra.mxu1 %v3699_v40  ;;  %v3783_v51 = vld [vmem:[#allocation8 + $0x7c8] ss:$16 sps:$4 sm:$0xff]   ;;  %v3788_v40 = vld [vmem:[#allocation8 + $0x56c] ss:$16 sps:$4 sm:$0xff]  }
 0x19c   :  { %2202 = vmatprep.subr.bf16.mxu0 %v3704_v53  ;;  %2239 = vmatprep.subr.bf16.mxu1 %v3707_v54  ;;  %v3791_v53 = vld [vmem:[#allocation8 + $0x7ac] ss:$16 sps:$4 sm:$0xff]   ;;  %v3786_v54 = vld [vmem:[#allocation8 + $0x568] ss:$16 sps:$4 sm:$0xff]  }
 0x19f   :  { %2203 = vmatpush2.bf16.msra.mxu0 %v3702_v56  ;;  %2240 = vmatpush2.bf16.msra.mxu1 %v3705_v57  ;;  %v3789_v56 = vld [vmem:[#allocation8 + $0x7a8] ss:$16 sps:$4 sm:$0xff]   ;;  %v3794_v57 = vld [vmem:[#allocation8 + $0x54c] ss:$16 sps:$4 sm:$0xff]  }
 0x1a0   :  { %2204 = vmatprep.subr.bf16.mxu0 %v3710_v33  ;;  %2241 = vmatprep.subr.bf16.mxu1 %v3713_v58  ;;  %v3797_v33 = vld [vmem:[#allocation8 + $0x78c] ss:$16 sps:$4 sm:$0xff]   ;;  %v3792_v58 = vld [vmem:[#allocation8 + $0x548] ss:$16 sps:$4 sm:$0xff]  }
 0x1a3   :  { %2205 = vmatpush2.bf16.msra.mxu0 %v3708_v60  ;;  %2242 = vmatpush2.bf16.msra.mxu1 %v3711_v61  ;;  %v3795_v60 = vld [vmem:[#allocation8 + $0x788] ss:$16 sps:$4 sm:$0xff]   ;;  %v3800_v61 = vld [vmem:[#allocation8 + $0x52c] ss:$16 sps:$4 sm:$0xff]  }
 0x1a4   :  { %2243 = vmatprep.subr.bf16.mxu1 %v3716_v63  ;;  %2256 = vmatprep.subr.bf16.mxu0 %v3719_v1  ;;  %v3803_v63 = vld [vmem:[#allocation8 + $0x76c] ss:$16 sps:$4 sm:$0xff]   ;;  %v3798_v1 = vld [vmem:[#allocation8 + $0x528] ss:$16 sps:$4 sm:$0xff]  }
 0x1a6   :  { %2207 = vmatmul.mubr.bf16.vlgmr.msra.gmra.mxu0 %v4200_v62  ;;  %v3732_v62 = vld [vmem:[#allocation8 + $0x488] ss:$16 sps:$4 sm:$0xff]  }
 0x1a7   :  { %2244 = vmatpush2.bf16.msra.mxu1 %v3714_v2  ;;  %2257 = vmatpush1.bf16.msra.mxu0 %v3717_v59  ;;  %v3801_v2 = vld [vmem:[#allocation8 + $0x768] ss:$16 sps:$4 sm:$0xff]   ;;  %v3806_v59 = vld [vmem:[#allocation8 + $0x50c] ss:$16 sps:$4 sm:$0xff]  }
 0x1a8   :  { %2288 = vmatprep.mubr.bf16.mxu0 %v4218_v34  ;;  %2245 = vmatprep.subr.bf16.mxu1 %v3722_v3  ;;  %v3740_v34 = vld [vmem:[#allocation8 + $0x46c] ss:$16 sps:$4 sm:$0xff]  }
 0x1a9   :  { %2258 = vmatprep.subr.bf16.mxu0 %v3725_v4  ;;  %v3809_v3 = vld [vmem:[#allocation8 + $0x74c] ss:$16 sps:$4 sm:$0xff]   ;;  %v3804_v4 = vld [vmem:[#allocation8 + $0x508] ss:$16 sps:$4 sm:$0xff]  }
 0x1ab   :  { %2246 = vmatpush2.bf16.msra.mxu1 %v3720_v5  ;;  %2259 = vmatpush1.bf16.msra.mxu0 %v3723_v6  ;;  %v3807_v5 = vld [vmem:[#allocation8 + $0x748] ss:$16 sps:$4 sm:$0xff]   ;;  %v3812_v6 = vld [vmem:[#allocation8 + $0x72c] ss:$16 sps:$4 sm:$0xff]  }
 0x1ac   :  { %2260 = vmatprep.subr.bf16.mxu0 %v3728_v7  ;;  %2297 = vmatprep.subr.bf16.mxu1 %v3731_v8  ;;  %v3818_v7 = vld [vmem:[#allocation10 + $0x74] ss:$8 sps:$4 sm:$0xff]   ;;  %v3810_v8 = vld [vmem:[#allocation8 + $0x728] ss:$16 sps:$4 sm:$0xff]  }
 0x1ae   :  { %2248 = vmatmul.mubr.bf16.vlgmr.msra.gmra.mxu1 %v4210_v16  ;;  %v3744_v16 = vld [vmem:[#allocation8 + $0x448] ss:$16 sps:$4 sm:$0xff]  }
 0x1af   :  { %2261 = vmatpush1.bf16.msra.mxu0 %v3726_v9  ;;  %2298 = vmatpush1.bf16.msra.mxu1 %v3729_v10  ;;  %v3816_v9 = vld [vmem:[#allocation10 + $0x70] ss:$8 sps:$4 sm:$0xff]   ;;  %v3815_v10 = vld [vmem:[#allocation8 + $0x70c] ss:$16 sps:$4 sm:$0xff]  }
 0x1b0   :  { %2329 = vmatprep.mubr.bf16.mxu1 %v4221_v55  ;;  %2262 = vmatprep.subr.bf16.mxu0 %v3734_v11  ;;  %v3755_v55 = vld [vmem:[#allocation8 + $0x66c] ss:$16 sps:$4 sm:$0xff]  }
 0x1b1   :  { %2299 = vmatprep.subr.bf16.mxu1 %v3737_v13  ;;  %v3821_v11 = vld [vmem:[#allocation10 + $0x64] ss:$8 sps:$4 sm:$0xff]  }
 0x1b3   :  { %2263 = vmatpush1.bf16.msra.mxu0 %v3732_v62  ;;  %2300 = vmatpush1.bf16.msra.mxu1 %v3735_v12  ;;  %v3813_v62 = vld [vmem:[#allocation8 + $0x708] ss:$16 sps:$4 sm:$0xff]  }
 0x1b4   :  { %2264 = vmatprep.subr.bf16.mxu0 %v3740_v34  ;;  %2301 = vmatprep.subr.bf16.mxu1 %v3743_v14  ;;  %v3819_v12 = vld [vmem:[#allocation10 + $0x60] ss:$8 sps:$4 sm:$0xff]   ;;  %v3824_v14 = vld [vmem:[#allocation10 + $0x54] ss:$8 sps:$4 sm:$0xff]  }
 0x1b7   :  { %2265 = vmatpush1.bf16.msra.mxu0 %v3738_v17  ;;  %2302 = vmatpush1.bf16.msra.mxu1 %v3741_v18  ;;  %v3822_v18 = vld [vmem:[#allocation10 + $0x50] ss:$8 sps:$4 sm:$0xff]  }
 0x1b8   :  { %2266 = vmatprep.subr.bf16.mxu0 %v3746_v19  ;;  %2303 = vmatprep.subr.bf16.mxu1 %v3749_v20  ;;  %v3827_v20 = vld [vmem:[#allocation10 + $0x44] ss:$8 sps:$4 sm:$0xff]  }
 0x1bb   :  { %2267 = vmatpush1.bf16.msra.mxu0 %v3744_v16  ;;  %2304 = vmatpush1.bf16.msra.mxu1 %v3747_v21  ;;  %v3825_v16 = vld [vmem:[#allocation10 + $0x40] ss:$8 sps:$4 sm:$0xff]  }
 0x1bc   :  { %2268 = vmatprep.subr.bf16.mxu0 %v3752_v22  ;;  %2305 = vmatprep.subr.bf16.mxu1 %v3755_v55  ;;  %v3830_v22 = vld [vmem:[#allocation10 + $0x34] ss:$8 sps:$4 sm:$0xff]  }
 0x1bf   :  { %2269 = vmatpush1.bf16.msra.mxu0 %v3750_v23  ;;  %2306 = vmatpush1.bf16.msra.mxu1 %v3753_v24  ;;  %v3828_v23 = vld [vmem:[#allocation10 + $0x30] ss:$8 sps:$4 sm:$0xff]  }
 0x1c0   :  { %2270 = vmatprep.subr.bf16.mxu0 %v3758_v25  ;;  %2307 = vmatprep.subr.bf16.mxu1 %v3761_v26  ;;  %v3833_v25 = vld [vmem:[#allocation10 + $0x24] ss:$8 sps:$4 sm:$0xff]   ;;  %v3864_v26 = vld [vmem:[#allocation10 + $0x170] ss:$8 sps:$4 sm:$0xff]  }
 0x1c3   :  { %2271 = vmatpush1.bf16.msra.mxu0 %v3756_v27  ;;  %2308 = vmatpush1.bf16.msra.mxu1 %v3759_v28  ;;  %v3866_v27 = vld [vmem:[#allocation10 + $0x174] ss:$8 sps:$4 sm:$0xff]   ;;  %v3869_v28 = vld [vmem:[#allocation10 + $0x164] ss:$8 sps:$4 sm:$0xff]  }
 0x1c4   :  { %2272 = vmatprep.subr.bf16.mxu0 %v3764_v29  ;;  %2309 = vmatprep.subr.bf16.mxu1 %v3767_v30  ;;  %v3867_v29 = vld [vmem:[#allocation10 + $0x160] ss:$8 sps:$4 sm:$0xff]   ;;  %v3836_v30 = vld [vmem:[#allocation10 + $0x14] ss:$8 sps:$4 sm:$0xff]  }
 0x1c7   :  { %2273 = vmatpush2.bf16.msra.mxu0 %v3762_v31  ;;  %2310 = vmatpush1.bf16.msra.mxu1 %v3765_v32  ;;  %v3872_v31 = vld [vmem:[#allocation10 + $0x154] ss:$8 sps:$4 sm:$0xff]   ;;  %v3834_v32 = vld [vmem:[#allocation10 + $0x10] ss:$8 sps:$4 sm:$0xff]  }
 0x1c8   :  { %2274 = vmatprep.subr.bf16.mxu0 %v3770_v35  ;;  %2311 = vmatprep.subr.bf16.mxu1 %v3773_v36  ;;  %v3870_v35 = vld [vmem:[#allocation10 + $0x150] ss:$8 sps:$4 sm:$0xff]   ;;  %v3839_v36 = vld [vmem:[#allocation10 + $0x4] ss:$8 sps:$4 sm:$0xff]  }
 0x1cb   :  { %2275 = vmatpush2.bf16.msra.mxu0 %v3768_v37  ;;  %2312 = vmatpush1.bf16.msra.mxu1 %v3771_v42  ;;  %v3875_v37 = vld [vmem:[#allocation10 + $0x144] ss:$8 sps:$4 sm:$0xff]   ;;  %v3837_v42 = vld [vmem:[#allocation10] ss:$8 sps:$4 sm:$0xff]  }
 0x1cc   :  { %2276 = vmatprep.subr.bf16.mxu0 %v3776_v43  ;;  %2313 = vmatprep.subr.bf16.mxu1 %v3779_v44  ;;  %v3873_v43 = vld [vmem:[#allocation10 + $0x140] ss:$8 sps:$4 sm:$0xff]   ;;  %v3842_v44 = vld [vmem:[#allocation10 + $0xf4] ss:$8 sps:$4 sm:$0xff]  }
 0x1cf   :  { %2277 = vmatpush2.bf16.msra.mxu0 %v3774_v15  ;;  %2314 = vmatpush2.bf16.msra.mxu1 %v3777_v45  ;;  %v3878_v15 = vld [vmem:[#allocation10 + $0x134] ss:$8 sps:$4 sm:$0xff]   ;;  %v3840_v45 = vld [vmem:[#allocation10 + $0xf0] ss:$8 sps:$4 sm:$0xff]  }
 0x1d0   :  { %2278 = vmatprep.subr.bf16.mxu0 %v3782_v47  ;;  %2315 = vmatprep.subr.bf16.mxu1 %v3785_v48  ;;  %v3876_v47 = vld [vmem:[#allocation10 + $0x130] ss:$8 sps:$4 sm:$0xff]   ;;  %v3845_v48 = vld [vmem:[#allocation10 + $0xe4] ss:$8 sps:$4 sm:$0xff]  }
 0x1d3   :  { %2279 = vmatpush2.bf16.msra.mxu0 %v3780_v49  ;;  %2316 = vmatpush2.bf16.msra.mxu1 %v3783_v51  ;;  %v3881_v49 = vld [vmem:[#allocation10 + $0x124] ss:$8 sps:$4 sm:$0xff]   ;;  %v3843_v51 = vld [vmem:[#allocation10 + $0xe0] ss:$8 sps:$4 sm:$0xff]  }
 0x1d4   :  { %2280 = vmatprep.subr.bf16.mxu0 %v3788_v40  ;;  %2317 = vmatprep.subr.bf16.mxu1 %v3791_v53  ;;  %v3879_v40 = vld [vmem:[#allocation10 + $0x120] ss:$8 sps:$4 sm:$0xff]   ;;  %v3848_v53 = vld [vmem:[#allocation10 + $0xd4] ss:$8 sps:$4 sm:$0xff]  }
 0x1d7   :  { %2281 = vmatpush2.bf16.msra.mxu0 %v3786_v54  ;;  %2318 = vmatpush2.bf16.msra.mxu1 %v3789_v56  ;;  %v3884_v54 = vld [vmem:[#allocation10 + $0x114] ss:$8 sps:$4 sm:$0xff]   ;;  %v3846_v56 = vld [vmem:[#allocation10 + $0xd0] ss:$8 sps:$4 sm:$0xff]  }
 0x1d8   :  { %2282 = vmatprep.subr.bf16.mxu0 %v3794_v57  ;;  %2319 = vmatprep.subr.bf16.mxu1 %v3797_v33  ;;  %v3882_v57 = vld [vmem:[#allocation10 + $0x110] ss:$8 sps:$4 sm:$0xff]   ;;  %v3851_v33 = vld [vmem:[#allocation10 + $0xc4] ss:$8 sps:$4 sm:$0xff]  }
 0x1db   :  { %2283 = vmatpush2.bf16.msra.mxu0 %v3792_v58  ;;  %2320 = vmatpush2.bf16.msra.mxu1 %v3795_v60  ;;  %v3887_v58 = vld [vmem:[#allocation10 + $0x104] ss:$8 sps:$4 sm:$0xff]   ;;  %v3849_v60 = vld [vmem:[#allocation10 + $0xc0] ss:$8 sps:$4 sm:$0xff]  }
 0x1dc   :  { %2284 = vmatprep.subr.bf16.mxu0 %v3800_v61  ;;  %2321 = vmatprep.subr.bf16.mxu1 %v3803_v63  ;;  %v3885_v61 = vld [vmem:[#allocation10 + $0x100] ss:$8 sps:$4 sm:$0xff]   ;;  %v3854_v63 = vld [vmem:[#allocation10 + $0xb4] ss:$8 sps:$4 sm:$0xff]  }
 0x1df   :  { %2285 = vmatpush2.bf16.msra.mxu0 %v3798_v1  ;;  %2322 = vmatpush2.bf16.msra.mxu1 %v3801_v2  ;;  %v3890_v1 = vld [vmem:[#allocation10 + $0x1f4] ss:$8 sps:$4 sm:$0xff]   ;;  %v3852_v2 = vld [vmem:[#allocation10 + $0xb0] ss:$8 sps:$4 sm:$0xff]  }
 0x1e0   :  { %2286 = vmatprep.subr.bf16.mxu0 %v3806_v59  ;;  %2323 = vmatprep.subr.bf16.mxu1 %v3809_v3  ;;  %v3888_v59 = vld [vmem:[#allocation10 + $0x1f0] ss:$8 sps:$4 sm:$0xff]   ;;  %v3857_v3 = vld [vmem:[#allocation10 + $0xa4] ss:$8 sps:$4 sm:$0xff]  }
 0x1e3   :  { %2287 = vmatpush2.bf16.msra.mxu0 %v3804_v4  ;;  %2324 = vmatpush2.bf16.msra.mxu1 %v3807_v5  ;;  %v3893_v4 = vld [vmem:[#allocation10 + $0x1e4] ss:$8 sps:$4 sm:$0xff]   ;;  %v3855_v5 = vld [vmem:[#allocation10 + $0xa0] ss:$8 sps:$4 sm:$0xff]  }
 0x1e4   :  { %2325 = vmatprep.subr.bf16.mxu1 %v3812_v6  ;;  %2750 = vmatprep.subr.bf16.mxu0 %v3818_v7  ;;  %v3891_v6 = vld [vmem:[#allocation10 + $0x1e0] ss:$8 sps:$4 sm:$0xff]   ;;  %v3860_v7 = vld [vmem:[#allocation10 + $0x94] ss:$8 sps:$4 sm:$0xff]  }
 0x1e6   :  { %2289 = vmatmul.mubr.bf16.vlgmr.msra.gmra.mxu0 %v4230_v52  ;;  %v4243_v13 = vpop.f32.mrf.mxu0 }
 0x1e7   :  { %2326 = vmatpush2.bf16.msra.mxu1 %v3810_v8  ;;  %2751 = vmatpush1.bf16.msra.mxu0 %v3816_v9  ;;  %v3896_v8 = vld [vmem:[#allocation10 + $0x1d4] ss:$8 sps:$4 sm:$0xff]   ;;  %v3858_v9 = vld [vmem:[#allocation10 + $0x90] ss:$8 sps:$4 sm:$0xff]  }
 0x1e8   :  { %v4245_v34 = vpop.f32.mrf.mxu0  ;;  %2327 = vmatprep.subr.bf16.mxu1 %v3815_v10  ;;  %2752 = vmatprep.subr.bf16.mxu0 %v3821_v11  ;;  %v3894_v10 = vld [vmem:[#allocation10 + $0x1d0] ss:$8 sps:$4 sm:$0xff]   ;;  %v3863_v11 = vld [vmem:[#allocation10 + $0x84] ss:$8 sps:$4 sm:$0xff]  }
 0x1ea   :  { %v2048_v17 = vpop.f32.mrf.mxu0 }
 0x1eb   :  { %2328 = vmatpush2.bf16.msra.mxu1 %v3813_v62  ;;  %2753 = vmatpush1.bf16.msra.mxu0 %v3819_v12  ;;  %v3899_v62 = vld [vmem:[#allocation10 + $0x1c4] ss:$8 sps:$4 sm:$0xff]   ;;  %v3861_v12 = vld [vmem:[#allocation10 + $0x80] ss:$8 sps:$4 sm:$0xff]   ;;  %v4255_v17 = vld [vmem:[%s4286_s4] sm:$0xf] }
 0x1ec   :  { %v2049_v19 = vpop.f32.mrf.mxu0  ;;  %2754 = vmatprep.subr.bf16.mxu0 %v3824_v14  ;;  %2791 = vmatprep.subr.bf16.mxu1 %v3866_v27  ;;  %v3897_v14 = vld [vmem:[#allocation10 + $0x1c0] ss:$8 sps:$4 sm:$0xff]  }
 0x1ee   :  { %2330 = vmatmul.mubr.bf16.vlgmr.msra.gmra.mxu1 %v4234_v0  ;;  %v4248_v52 = vpop.f32.mrf.mxu1  ;;  %v3831_v0 = vld [vmem:[#allocation10 + $0x20] ss:$8 sps:$4 sm:$0xff]  }
 0x1ef   :  { %2755 = vmatpush1.bf16.msra.mxu0 %v3822_v18  ;;  %2792 = vmatpush1.bf16.msra.mxu1 %v3864_v26  ;;  %v713_v18 = vrot.slane %v4255_v17, %v4179_v39 }
 0x1f0   :  { %v4250_v21 = vpop.f32.mrf.mxu1  ;;  %2756 = vmatprep.subr.bf16.mxu0 %v3827_v20  ;;  %2793 = vmatprep.subr.bf16.mxu1 %v3869_v28  ;;  %v717_v20 = vrot.slane %v4255_v17, %v4184_v41  ;;  %v3903_v28 = vld [vmem:[#allocation10 + $0x1a0] ss:$8 sps:$4 sm:$0xff]  }
 0x1f2   :  { %v2089_v55 = vpop.f32.mrf.mxu1 }
 0x1f3   :  { %2757 = vmatpush1.bf16.msra.mxu0 %v3825_v16  ;;  %2794 = vmatpush1.bf16.msra.mxu1 %v3867_v29  ;;  %v2045_v55 = vadd.f32 %v4243_v13, %v713_v18 }
 0x1f4   :  { %v2090_v24 = vpop.f32.mrf.mxu1  ;;  %2758 = vmatprep.subr.bf16.mxu0 %v3830_v22  ;;  %2795 = vmatprep.subr.bf16.mxu1 %v3872_v31  ;;  %v3902_v22 = vld [vmem:[#allocation10 + $0x1b4] ss:$8 sps:$4 sm:$0xff]  }
 0x1f5   :  { %v2086_v26 = vadd.f32 %v4248_v52, %v2045_v55 }
 0x1f7   :  { %2759 = vmatpush1.bf16.msra.mxu0 %v3828_v23  ;;  %2796 = vmatpush1.bf16.msra.mxu1 %v3870_v35  ;;  %v3900_v23 = vld [vmem:[#allocation10 + $0x1b0] ss:$8 sps:$4 sm:$0xff]  }
 0x1f8   :  { %2760 = vmatprep.subr.bf16.mxu0 %v3833_v25  ;;  %2797 = vmatprep.subr.bf16.mxu1 %v3875_v37  ;;  %v2047_v25 = vadd.f32 %v4245_v34, %v717_v20  ;;  %v3906_v34 = vld [vmem:[#allocation10 + $0x190] ss:$8 sps:$4 sm:$0xff]  }
 0x1fa   :  { %v2088_v29 = vadd.f32 %v4250_v21, %v2047_v25  ;;  %v3909_v21 = vld [vmem:[#allocation10 + $0x180] ss:$8 sps:$4 sm:$0xff]  }
 0x1fb   :  { %2761 = vmatpush1.bf16.msra.mxu0 %v3831_v0  ;;  %2798 = vmatpush1.bf16.msra.mxu1 %v3873_v43  ;;  %v3905_v0 = vld [vmem:[#allocation10 + $0x1a4] ss:$8 sps:$4 sm:$0xff]  }
 0x1fc   :  { %2762 = vmatprep.subr.bf16.mxu0 %v3836_v30  ;;  %2799 = vmatprep.subr.bf16.mxu1 %v3878_v15 }
 0x1ff   :  { %2763 = vmatpush1.bf16.msra.mxu0 %v3834_v32  ;;  %2800 = vmatpush1.bf16.msra.mxu1 %v3876_v47 }
 0x200   :  { %2764 = vmatprep.subr.bf16.mxu0 %v3839_v36  ;;  %2801 = vmatprep.subr.bf16.mxu1 %v3881_v49  ;;  %v3908_v36 = vld [vmem:[#allocation10 + $0x194] ss:$8 sps:$4 sm:$0xff]  }
 0x203   :  { %2765 = vmatpush1.bf16.msra.mxu0 %v3837_v42  ;;  %2802 = vmatpush1.bf16.msra.mxu1 %v3879_v40 }
 0x204   :  { %2766 = vmatprep.subr.bf16.mxu0 %v3842_v44  ;;  %2803 = vmatprep.subr.bf16.mxu1 %v3884_v54 }
 0x207   :  { %2767 = vmatpush2.bf16.msra.mxu0 %v3840_v45  ;;  %2804 = vmatpush1.bf16.msra.mxu1 %v3882_v57  ;;  %v3911_v45 = vld [vmem:[#allocation10 + $0x184] ss:$8 sps:$4 sm:$0xff]  }
 0x208   :  { %2768 = vmatprep.subr.bf16.mxu0 %v3845_v48  ;;  %2805 = vmatprep.subr.bf16.mxu1 %v3887_v58 }
 0x20b   :  { %2769 = vmatpush2.bf16.msra.mxu0 %v3843_v51  ;;  %2806 = vmatpush1.bf16.msra.mxu1 %v3885_v61  ;;  %v3913_v61 = vld [vmem:[#allocation11 + $0x38] sm:$0xff]  }
 0x20c   :  { %2770 = vmatprep.subr.bf16.mxu0 %v3848_v53  ;;  %2807 = vmatprep.subr.bf16.mxu1 %v3890_v1  ;;  %v3915_v1 = vld [vmem:[#allocation11 + $0x30] sm:$0xff]  }
 0x20f   :  { %2771 = vmatpush2.bf16.msra.mxu0 %v3846_v56  ;;  %2808 = vmatpush2.bf16.msra.mxu1 %v3888_v59  ;;  %v3917_v59 = vld [vmem:[#allocation11 + $0x28] sm:$0xff]  }
 0x210   :  { %2772 = vmatprep.subr.bf16.mxu0 %v3851_v33  ;;  %2809 = vmatprep.subr.bf16.mxu1 %v3893_v4  ;;  %v3919_v4 = vld [vmem:[#allocation11 + $0x20] sm:$0xff]  }
 0x213   :  { %2773 = vmatpush2.bf16.msra.mxu0 %v3849_v60  ;;  %2810 = vmatpush2.bf16.msra.mxu1 %v3891_v6  ;;  %v3912_v60 = vld [vmem:[#allocation11 + $0x78] sm:$0xff]  }
 0x214   :  { %2774 = vmatprep.subr.bf16.mxu0 %v3854_v63  ;;  %2811 = vmatprep.subr.bf16.mxu1 %v3896_v8  ;;  %v3914_v63 = vld [vmem:[#allocation11 + $0x70] sm:$0xff]   ;;  %v3921_v6 = vld [vmem:[#allocation11 + $0x18] sm:$0xff]   ;;  %v721_v8 = vrot.slane %v4255_v17, %v142_v46 }
 0x217   :  { %2775 = vmatpush2.bf16.msra.mxu0 %v3852_v2  ;;  %2812 = vmatpush2.bf16.msra.mxu1 %v3894_v10  ;;  %v3916_v2 = vld [vmem:[#allocation11 + $0x68] sm:$0xff]   ;;  %v725_v10 = vrot.slane %v4255_v17, %v146_v50 }
 0x218   :  { %2776 = vmatprep.subr.bf16.mxu0 %v3857_v3  ;;  %2813 = vmatprep.subr.bf16.mxu1 %v3899_v62  ;;  %v3918_v3 = vld [vmem:[#allocation11 + $0x60] sm:$0xff]  }
 0x21b   :  { %2777 = vmatpush2.bf16.msra.mxu0 %v3855_v5  ;;  %2814 = vmatpush2.bf16.msra.mxu1 %v3897_v14  ;;  %v3920_v5 = vld [vmem:[#allocation11 + $0x58] sm:$0xff]  }
 0x21c   :  { %2778 = vmatprep.subr.bf16.mxu0 %v3860_v7  ;;  %2815 = vmatprep.subr.bf16.mxu1 %v3902_v22  ;;  %v3922_v7 = vld [vmem:[#allocation11 + $0x50] sm:$0xff]  }
 0x21f   :  { %2779 = vmatpush2.bf16.msra.mxu0 %v3858_v9  ;;  %2816 = vmatpush2.bf16.msra.mxu1 %v3900_v23 }
 0x220   :  { %2780 = vmatprep.subr.bf16.mxu0 %v3863_v11  ;;  %2817 = vmatprep.subr.bf16.mxu1 %v3905_v0 }
 0x223   :  { %2781 = vmatpush2.bf16.msra.mxu0 %v3861_v12  ;;  %2818 = vmatpush2.bf16.msra.mxu1 %v3903_v28 }
 0x224   :  { %2819 = vmatprep.subr.bf16.mxu1 %v3908_v36  ;;  %3394 = vmatprep.subr.bf16.mxu0 %v3912_v60 }
 0x226   :  { %v2126_v19 = vpop.f32.mrf.mxu0 }
 0x227   :  { %v2127_v30 = vadd.f32 %v2126_v19, %v2086_v26  ;;  %2820 = vmatpush2.bf16.msra.mxu1 %v3906_v34  ;;  %v2418_v34 = vld [vmem:[%s4288_s6] sm:$0x3] }
 0x228   :  { %v2128_v16 = vpop.f32.mrf.mxu0  ;;  %2821 = vmatprep.subr.bf16.mxu1 %v3911_v45 }
 0x229   :  { %v2129_v32 = vadd.f32 %v2128_v16, %v2088_v29  ;;  %v3923_v29 = vld [vmem:[#allocation11 + $0x10] sm:$0xff]  }
 0x22a   :  { %v2130_v24 = vpop.f32.mrf.mxu0 }
 0x22b   :  { %2822 = vmatpush2.bf16.msra.mxu1 %v3909_v21 }
 0x22c   :  { %v2131_v27 = vpop.f32.mrf.mxu0 }
 0x22e   :  { %v2167_v31 = vpop.f32.mrf.mxu1 }
 0x22f   :  { %v2168_v35 = vadd.f32 %v2167_v31, %v2127_v30 }
 0x230   :  { %v2169_v13 = vpop.f32.mrf.mxu1 }
 0x231   :  { %vm2338_vm9 = vcmp.gt.f32.partialorder %v2168_v35, 0.0  ;;  %v2342_v37 = vmul.f32 0.01, %v2168_v35  ;;  %v2170_v42 = vadd.f32 %v2169_v13, %v2129_v32  ;;  %v3924_v32 = vld [vmem:[#allocation11 + $0x48] sm:$0xff]  }
 0x232   :  { %v2171_v43 = vpop.f32.mrf.mxu1 }
 0x233   :  { %vm2339_vm10 = vcmp.gt.f32.partialorder %v2170_v42, 0.0  ;;  %v2343_v52 = vmul.f32 0.01, %v2170_v42  ;;  %v2346_v44 = vsel %vm2338_vm9, %v2168_v35, %v2342_v37  ;;  %v3925_v35 = vld [vmem:[#allocation11 + $0x8] sm:$0xff]   ;;  %v3926_v37 = vld [vmem:[#allocation11 + $0x40] sm:$0xff]   ;;  %v2423_v43 = vrot.slane %v2418_v34, %v4179_v39 }
 0x234   :  { %v2172_v15 = vpop.f32.mrf.mxu1  ;;  %v2350_v49 = vpack.c.bf16 %v2346_v44, %v2346_v44 }
 0x235   :  { %v2347_v47 = vsel %vm2339_vm10, %v2170_v42, %v2343_v52  ;;  %v3927_v42 = vld [vmem:[#allocation11] sm:$0xff]   ;;  %v2427_v52 = vrot.slane %v2418_v34, %v4184_v41  ;;  %v3377_v41 = vld [vmem:[%s4290_s8] ss:$0 sm:$0xff] }
 0x236   :  { %v2351_v48 = vpack.c.bf16 %v2347_v47, %v2347_v47 }
 0x238   :  { %2782 = vmatprep.mubr.bf16.mxu0 %v2351_v48 }
 0x239   :  { %2783 = vmatmul.mubr.bf16.vlgmr.msra.gmra.mxu0 %v2350_v49 }
 0x23a   :  { %3395 = vmatpush3.bf16.msra.mxu0 %v3913_v61 }
 0x23b   :  { %3396 = vmatprep.subr.bf16.mxu0 %v3914_v63 }
 0x23e   :  { %3397 = vmatpush3.bf16.msra.mxu0 %v3915_v1 }
 0x23f   :  { %3398 = vmatprep.subr.bf16.mxu0 %v3916_v2 }
 0x242   :  { %3399 = vmatpush3.bf16.msra.mxu0 %v3917_v59 }
 0x243   :  { %3400 = vmatprep.subr.bf16.mxu0 %v3918_v3 }
 0x246   :  { %3401 = vmatpush3.bf16.msra.mxu0 %v3919_v4 }
 0x247   :  { %3402 = vmatprep.subr.bf16.mxu0 %v3920_v5 }
 0x24a   :  { %3403 = vmatpush3.bf16.msra.mxu0 %v3921_v6 }
 0x24b   :  { %3404 = vmatprep.subr.bf16.mxu0 %v3922_v7 }
 0x24e   :  { %3405 = vmatpush3.bf16.msra.mxu0 %v3923_v29 }
 0x24f   :  { %3406 = vmatprep.subr.bf16.mxu0 %v3924_v32 }
 0x252   :  { %3407 = vmatpush3.bf16.msra.mxu0 %v3925_v35 }
 0x253   :  { %3408 = vmatprep.subr.bf16.mxu0 %v3926_v37 }
 0x256   :  { %3409 = vmatpush3.bf16.msra.mxu0 %v3927_v42 }
 0x266   :  { %v2208_v51 = vpop.f32.mrf.mxu0 }
 0x267   :  { %v2209_v62 = vadd.f32 %v2208_v51, %v721_v8 }
 0x268   :  { %v2210_v40 = vpop.f32.mrf.mxu0 }
 0x269   :  { %v2211_v14 = vadd.f32 %v2210_v40, %v725_v10 }
 0x26a   :  { %v2212_v53 = vpop.f32.mrf.mxu0 }
 0x26c   :  { %v2213_v54 = vpop.f32.mrf.mxu0 }
 0x26e   :  { %v2249_v56 = vpop.f32.mrf.mxu1 }
 0x26f   :  { %v2250_v18 = vadd.f32 %v2249_v56, %v2209_v62 }
 0x270   :  { %v2251_v57 = vpop.f32.mrf.mxu1 }
 0x271   :  { %v2252_v20 = vadd.f32 %v2251_v57, %v2211_v14 }
 0x272   :  { %v2253_v33 = vpop.f32.mrf.mxu1 }
 0x274   :  { %v2254_v58 = vpop.f32.mrf.mxu1 }
 0x2a6   :  { %v2290_v9 = vpop.f32.mrf.mxu0 }
 0x2a7   :  { %v2291_v16 = vadd.f32 %v2290_v9, %v2250_v18 }
 0x2a8   :  { %v2292_v11 = vpop.f32.mrf.mxu0 }
 0x2a9   :  { %v2293_v55 = vadd.f32 %v2292_v11, %v2252_v20 }
 0x2aa   :  { %v2294_v12 = vpop.f32.mrf.mxu0 }
 0x2ac   :  { %v2295_v19 = vpop.f32.mrf.mxu0 }
 0x2ae   :  { %v2331_v22 = vpop.f32.mrf.mxu1 }
 0x2af   :  { %v2332_v23 = vadd.f32 %v2331_v22, %v2291_v16 }
 0x2b0   :  { %v2333_v24 = vpop.f32.mrf.mxu1 }
 0x2b1   :  { %vm2340_vm11 = vcmp.gt.f32.partialorder %v2332_v23, 0.0  ;;  %v2344_v25 = vmul.f32 0.01, %v2332_v23  ;;  %v2334_v46 = vadd.f32 %v2333_v24, %v2293_v55 }
 0x2b2   :  { %v2335_v26 = vpop.f32.mrf.mxu1 }
 0x2b3   :  { %vm2341_vm12 = vcmp.gt.f32.partialorder %v2334_v46, 0.0  ;;  %v2345_v38 = vmul.f32 0.01, %v2334_v46  ;;  %v2348_v27 = vsel %vm2340_vm11, %v2332_v23, %v2344_v25 }
 0x2b4   :  { %v2336_v50 = vpop.f32.mrf.mxu1  ;;  %v2352_v0 = vpack.c.bf16 %v2348_v27, %v2348_v27 }
 0x2b5   :  { %v2349_v17 = vsel %vm2341_vm12, %v2334_v46, %v2345_v38 }
 0x2b6   :  { %v2353_v28 = vpack.c.bf16 %v2349_v17, %v2349_v17 }
 0x2b8   :  { %2823 = vmatprep.mubr.bf16.mxu1 %v2353_v28 }
 0x2b9   :  { %2824 = vmatmul.mubr.bf16.vlgmr.msra.gmra.mxu1 %v2352_v0 }
 0x2f9   :  { %v2784_v30 = vpop.f32.mrf.mxu0 }
 0x2fa   :  { %v2785_v44 = vadd.f32 %v2784_v30, %v2423_v43 }
 0x2fb   :  { %v2786_v31 = vpop.f32.mrf.mxu0 }
 0x2fc   :  { %v2787_v21 = vadd.f32 %v2786_v31, %v2427_v52 }
 0x2fd   :  { %v2788_v13 = vpop.f32.mrf.mxu0 }
 0x2ff   :  { %v2789_v36 = vpop.f32.mrf.mxu0 }
 0x379   :  { %v2825_v15 = vpop.f32.mrf.mxu1 }
 0x37a   :  { %v2826_v45 = vadd.f32 %v2825_v15, %v2785_v44 }
 0x37b   :  { %v2827_v47 = vpop.f32.mrf.mxu1 }
 0x37c   :  { %vm2832_vm13 = vcmp.gt.f32.partialorder %v2826_v45, 0.0  ;;  %v2834_v48 = vmul.f32 0.01, %v2826_v45  ;;  %v2828_v49 = vadd.f32 %v2827_v47, %v2787_v21 }
 0x37d   :  { %v2829_v51 = vpop.f32.mrf.mxu1 }
 0x37e   :  { %vm2833_vm14 = vcmp.gt.f32.partialorder %v2828_v49, 0.0  ;;  %v2835_v40 = vmul.f32 0.01, %v2828_v49  ;;  %v2836_v53 = vsel %vm2832_vm13, %v2826_v45, %v2834_v48 }
 0x37f   :  { %v2830_v54 = vpop.f32.mrf.mxu1  ;;  %v2838_v33 = vpack.c.bf16 %v2836_v53, %v2836_v53 }
 0x380   :  { %v2837_v56 = vsel %vm2833_vm14, %v2828_v49, %v2835_v40 }
 0x381   :  { %v2839_v57 = vpack.c.bf16 %v2837_v56, %v2837_v56 }
 0x383   :  { %3007 = vmatprep.mubr.bf16.mxu0 %v2839_v57 }
 0x384   :  { %3008 = vmatmul.mubr.bf16.vlgmr.msra.gmra.mxu0 %v2838_v33 }
 0x444   :  { %v3410_v39 = vpop.f32.mrf.mxu0 }
 0x446   :  { %v3411_v58 = vpop.f32.mrf.mxu0 }
 0x447   :  { %v3412_v60 = vadd.f32 %v3411_v58, %v3410_v39 }
 0x448   :  { %v3413_v61 = vpop.f32.mrf.mxu0 }
 0x449   :  { %v3010_v63 = vadd.f32 %v3412_v60, %v3377_v41 }
 0x44a   :  { %v3414_v1 = vpop.f32.mrf.mxu0 }
 0x44b   :  { %v3016_v2 = vmul.f32 0.01, %v3010_v63  ;;  %vm3015_vm15 = vcmp.gt.f32.partialorder %v3010_v63, 0.0 }
 0x44d   :  { %v3017_v59 = vsel %vm3015_vm15, %v3010_v63, %v3016_v2 }
 0x44e   :  { %3018 = vst [vmem:[#allocation13] sm:$0xff] %v3017_v59 }
 0x44f   :  { %4059 = shalt.err (!%p4056_p6)
}
 0x450   :  { %3028 = dma.vmem_to_hbm [thread:$0]  %s3026_s25, 128, %s4291_s9, [#allocation4]  }
 0x451   :  { %4076 = dma.done.wait [#allocation4], 128  }
 0x452   :  { %4077 = vsyncadd [#allocation4], 4294967168 }
 0x453   :  { %3032 = vsyncpa [#allocation3], 1 }
 0x454   :  { %3033 = vsyncpa [#allocation6], 1 }
 0x455   :  { %3034 = vsyncpa [#allocation9], 1 }
 0x456   :  { %3035 = vsyncpa [#allocation12], 1 }
 0x457   :  { %3036 = vsyncpa [#allocation4], 1 }

</bundles_post_ra>
